<compile_context>
chip_gen: v6e
topology: v6e:2x2x1
jax: 0.10.0
libtpu: 0.0.40
codegen_flags: <defaults>
</compile_context>

<pallas_src>
import functools
import math

import jax
import jax.numpy as jnp
from jax.experimental import pallas as pl
from jax.experimental.pallas import tpu as pltpu

LOG_STD_MAX = 2.0
LOG_STD_MIN = -20.0
_LOG2 = math.log(2.0)
_HALF_LOG_2PI = 0.5 * math.log(2.0 * math.pi)


def _round_up(x, m):
    return ((x + m - 1) // m) * m


def _actor_kernel(obs_ref, eps_ref,
                  w1_ref, b1_ref, w2_ref, b2_ref, wh_ref, bh_ref,
                  pi_ref, logp_ref, *, act_dim, act_limit, matmul_dtype):
    """Feature-major layout: the batch tile TB is the lane (last) dim everywhere.

    obs_ref : (O, TB)  f32     eps_ref : (S, A, TB) f32
    w1_ref  : (H1, O)  md      b1_ref  : (H1, 1)    f32
    w2_ref  : (H2, H1) md      b2_ref  : (H2, 1)    f32
    wh_ref  : (2A, H2) f32     bh_ref  : (2A, 1)    f32   (fused mu/log_std head)
    pi_ref  : (S, A, TB)       logp_ref: (S, TB)
    """
    md = matmul_dtype
    x = obs_ref[...]                                                   # (O, TB)

    # ---- MLP body (MXU matmuls, f32 accumulation) ----
    h1 = jnp.maximum(
        jnp.dot(w1_ref[...], x.astype(md),
                preferred_element_type=jnp.float32) + b1_ref[...], 0.0)
    h2 = jnp.maximum(
        jnp.dot(w2_ref[...], h1.astype(md),
                preferred_element_type=jnp.float32) + b2_ref[...], 0.0)

    # ---- fused head: single (2A, H2) matmul, kept in f32 (accuracy-critical,
    # negligible FLOPs).  Split at row A: with act_dim == 8 this lands exactly
    # on the f32 (8, 128) sublane tile boundary, so the slice is free.
    head = jnp.dot(wh_ref[...], h2,
                   preferred_element_type=jnp.float32) + bh_ref[...]  # (2A, TB)
    mu = head[:act_dim]                                                # (A, TB)
    log_std = jnp.clip(head[act_dim:], LOG_STD_MIN, LOG_STD_MAX)       # (A, TB)
    std = jnp.exp(log_std)

    # ---- reparameterized sample: pi = mu + std * eps ----
    eps = eps_ref[...]                                                 # (S, A, TB)
    pi = mu[None] + std[None] * eps                                    # (S, A, TB)

    # ---- log-prob: Normal log-pdf + tanh-squash correction, fused into one
    # per-element term and a single cross-sublane reduction over A.
    # (pi - mu)/std == eps exactly, so the Normal quadratic term is eps^2.
    t = (-0.5) * eps * eps - 2.0 * (_LOG2 - pi - jnp.logaddexp(0.0, -2.0 * pi))
    logp_ref[...] = (jnp.sum(t, axis=1)
                     - jnp.sum(log_std, axis=0, keepdims=True)
                     - act_dim * _HALF_LOG_2PI)                        # (S, TB)

    pi_ref[...] = (act_limit * jnp.tanh(pi)).astype(pi_ref.dtype)      # (S, A, TB)


def squashed_gaussian_actor_forward(obs, params, eps, act_limit=1.0,
                                    tile_batch=1024,
                                    matmul_dtype=jnp.bfloat16,
                                    pi_dtype=jnp.float32,
                                    batch_major_output=True):
    """Forward(obs, deterministic=False, with_logp_pi=True, num_samples=S).

    obs: (B, O) f32; params = (w1,b1,w2,b2,w3,b3) in (in,out)/(1,out) layout;
    eps: (S, B, A) f32 base Gaussian noise (rsample's reparameterization).
    Returns pi_action, logp_pi:
      batch_major_output=True  -> pi (S, B, A) [module layout]
      batch_major_output=False -> pi (S, A, B) [kernel-native, no transpose]
    """
    w1, b1, w2, b2, w3, b3 = params
    B, O = obs.shape
    S, Be, A = eps.shape
    assert Be == B and w3.shape[1] == 2 * A
    H1, H2 = w1.shape[1], w2.shape[1]

    # ---- layout plumbing (tiny XLA ops, outside the hot loop) ----
    w1_t = w1.T.astype(matmul_dtype)                   # (H1, O)
    w2_t = w2.T.astype(matmul_dtype)                   # (H2, H1)
    w_h_t = w3.T.astype(jnp.float32)                   # (2A, H2)  fused head, f32
    b1_t = b1.reshape(H1, 1).astype(jnp.float32)
    b2_t = b2.reshape(H2, 1).astype(jnp.float32)
    b_h_t = b3.reshape(2 * A, 1).astype(jnp.float32)

    # ---- batch tiling: lanes of 128.  Large TB amortizes the ~0.35us/step
    # pipeline overhead (per-step live set is only a few MiB even at TB=2048).
    # On v7x, guarantee >= 2 grid steps so ("parallel",) splits across both
    # TensorCores (no-op on single-TC v5e/v6e).
    B128 = _round_up(B, 128)
    TB = min(_round_up(tile_batch, 128), B128)
    if B128 // TB < 2 and B128 >= 256:
        TB = _round_up(B128 // 2, 128)
    B_pad = _round_up(B, TB)
    grid_steps = B_pad // TB

    obs_t = jnp.pad(obs.T, ((0, 0), (0, B_pad - B)))                   # (O, B_pad)
    # TODO(synk): eps could be generated on-chip (pltpu.prng_seed +
    # pltpu.stateful_normal), removing ~1/3 of per-step HBM input traffic and
    # this transpose+pad, but that changes the RNG stream vs. externally
    # supplied rsample noise; kept external for reference parity.
    eps_t = jnp.pad(jnp.transpose(eps, (0, 2, 1)),
                    ((0, 0), (0, 0), (0, B_pad - B)))                  # (S, A, B_pad)

    kernel = functools.partial(_actor_kernel, act_dim=A,
                               act_limit=float(act_limit),
                               matmul_dtype=matmul_dtype)

    def resident(shape):
        # Constant index_map -> the block stays VMEM-resident across grid steps.
        # TODO(synk): pipeline_mode=pl.Buffered(1) would single-buffer these
        # resident weights (~halves their VMEM, < 0.5 MiB total here).
        return pl.BlockSpec(shape, lambda i: (0,) * len(shape))

    # ---- VMEM budget + advisory cost estimate ----
    w_itemsize = jnp.dtype(matmul_dtype).itemsize
    weight_bytes = ((H1 * O + H2 * H1) * w_itemsize
                    + 2 * A * H2 * 4 + (H1 + H2 + 2 * A) * 4)
    io_tile_bytes = 4 * TB * (O + 2 * S * A + S)          # obs+eps+pi+logp /step
    temp_tile_bytes = 4 * TB * (H1 + H2 + 2 * A + 3 * S * A)
    vmem_est = 2 * io_tile_bytes + weight_bytes + temp_tile_bytes + (4 << 20)
    vmem_limit = int(min(max(vmem_est, 32 << 20), 64 << 20))

    cost = pl.CostEstimate(
        flops=int(2 * B_pad * (H1 * O + H2 * H1 + 2 * A * H2)),
        transcendentals=int(B_pad * A * (1 + 3 * S)),
        bytes_accessed=int(4 * B_pad * (O + 2 * S * A + S)
                           + grid_steps * weight_bytes),
    )

    pi_t, logp = pl.pallas_call(
        kernel,
        out_shape=(
            jax.ShapeDtypeStruct((S, A, B_pad), pi_dtype),
            jax.ShapeDtypeStruct((S, B_pad), jnp.float32),
        ),
        grid=(grid_steps,),
        in_specs=[
            pl.BlockSpec((O, TB), lambda i: (0, i)),          # obs_t  (tiled)
            pl.BlockSpec((S, A, TB), lambda i: (0, 0, i)),    # eps_t  (tiled)
            resident(w1_t.shape), resident(b1_t.shape),
            resident(w2_t.shape), resident(b2_t.shape),
            resident(w_h_t.shape), resident(b_h_t.shape),
        ],
        out_specs=(
            pl.BlockSpec((S, A, TB), lambda i: (0, 0, i)),    # pi_t  (lane-dense)
            pl.BlockSpec((S, TB), lambda i: (0, i)),          # logp  (lane-dense)
        ),
        compiler_params=pltpu.CompilerParams(
            dimension_semantics=("parallel",),                # megacore on v7x
            vmem_limit_bytes=vmem_limit),
        cost_estimate=cost,
    )(obs_t, eps_t, w1_t, b1_t, w2_t, b2_t, w_h_t, b_h_t)

    logp = logp[:, :B]
    if batch_major_output:
        pi = jnp.transpose(pi_t[:, :, :B], (0, 2, 1))         # (S, B, A)
    else:
        pi = pi_t[:, :, :B]                                   # (S, A, B) native
    return pi, logp


def _reference_forward(obs, params, eps, act_limit=1.0):
    """Pure-JAX f32 reference mirroring the PyTorch forward."""
    w1, b1, w2, b2, w3, b3 = params
    A = eps.shape[-1]
    h1 = jax.nn.relu(obs @ w1 + b1)
    h2 = jax.nn.relu(h1 @ w2 + b2)
    net_out = h2 @ w3 + b3
    mu, log_std = net_out[:, :A], net_out[:, A:]
    log_std = jnp.clip(log_std, LOG_STD_MIN, LOG_STD_MAX)
    std = jnp.exp(log_std)
    pi = mu[None] + std[None] * eps
    logp = jnp.sum(
        -0.5 * ((pi - mu[None]) / std[None]) ** 2
        - log_std[None] - 0.5 * math.log(2.0 * math.pi), axis=-1)
    logp -= jnp.sum(
        2.0 * (math.log(2.0) - pi - jax.nn.softplus(-2.0 * pi)), axis=-1)
    return act_limit * jnp.tanh(pi), logp


if __name__ == "__main__":
    # Module-consistent small shapes: obs_dim=16, act_dim=8,
    # hidden_sizes=[256, 256] (module default), batch=8, num_samples=2.
    B, O, A = 8, 16, 8
    H1 = H2 = 256
    S = 2
    act_limit = 1.0

    key = jax.random.PRNGKey(0)
    k = jax.random.split(key, 5)

    obs = jax.random.normal(k[0], (B, O), jnp.float32)
    # Deterministic synthetic parameter init (no checkpoint loading).
    w1 = 0.1 * jax.random.normal(k[1], (O, H1), jnp.float32)
    b1 = 0.01 * jnp.ones((1, H1), jnp.float32)
    w2 = 0.1 * jax.random.normal(k[2], (H1, H2), jnp.float32)
    b2 = 0.01 * jnp.ones((1, H2), jnp.float32)
    w3 = 0.1 * jax.random.normal(k[3], (H2, 2 * A), jnp.float32)
    b3 = jnp.zeros((1, 2 * A), jnp.float32)
    params = (w1, b1, w2, b2, w3, b3)

    # Base Gaussian noise for the reparameterized rsample (glue, not hot path).
    eps = jax.random.normal(k[4], (S, B, A), jnp.float32)

    pi_ref, logp_ref = _reference_forward(obs, params, eps, act_limit)

    # 1) f32-matmul path: exact check against the PyTorch-equivalent reference.
    pi32, logp32 = squashed_gaussian_actor_forward(
        obs, params, eps, act_limit=act_limit, matmul_dtype=jnp.float32)
    jax.block_until_ready((pi32, logp32))
    assert pi32.shape == (S, B, A) and logp32.shape == (S, B)
    assert jnp.allclose(pi32, pi_ref, atol=1e-4, rtol=1e-4)
    assert jnp.allclose(logp32, logp_ref, atol=1e-3, rtol=1e-4)

    # 2) bf16 MLP body + f32 head (v5e/v6e/v7x perf config): tighter than the
    #    old fully-bf16 head thanks to the f32 head matmul.
    pi16, logp16 = squashed_gaussian_actor_forward(
        obs, params, eps, act_limit=act_limit, matmul_dtype=jnp.bfloat16)
    jax.block_until_ready((pi16, logp16))
    assert pi16.shape == (S, B, A) and logp16.shape == (S, B)
    assert jnp.allclose(pi16, pi_ref, atol=0.1, rtol=0.05)
    assert jnp.allclose(logp16, logp_ref, atol=0.5, rtol=0.1)

    # 3) Lightweight-output config: bf16 pi, kernel-native feature-major layout
    #    (no post-kernel transpose round trip).
    pi_fm, logp_fm = squashed_gaussian_actor_forward(
        obs, params, eps, act_limit=act_limit, matmul_dtype=jnp.bfloat16,
        pi_dtype=jnp.bfloat16, batch_major_output=False)
    jax.block_until_ready((pi_fm, logp_fm))
    assert pi_fm.shape == (S, A, B) and pi_fm.dtype == jnp.bfloat16
    assert logp_fm.shape == (S, B)
    assert jnp.allclose(pi_fm.astype(jnp.float32),
                        jnp.transpose(pi_ref, (0, 2, 1)), atol=0.1, rtol=0.05)
    assert jnp.all(jnp.isfinite(logp_fm))

    print("KERNEL_OK")
</pallas_src>

<mosaic_0001>
module attributes {stable_mosaic.version = 11 : i64} {
  func.func @_actor_kernel(%arg0: i32, %arg1: memref<16x128xf32, #tpu.memory_space<vmem>>, %arg2: memref<2x8x128xf32, #tpu.memory_space<vmem>>, %arg3: memref<256x16xf32, #tpu.memory_space<vmem>>, %arg4: memref<256x1xf32, #tpu.memory_space<vmem>>, %arg5: memref<256x256xf32, #tpu.memory_space<vmem>>, %arg6: memref<256x1xf32, #tpu.memory_space<vmem>>, %arg7: memref<16x256xf32, #tpu.memory_space<vmem>>, %arg8: memref<16x1xf32, #tpu.memory_space<vmem>>, %arg9: memref<2x8x128xf32, #tpu.memory_space<vmem>>, %arg10: memref<2x128xf32, #tpu.memory_space<vmem>>) attributes {dimension_semantics = [#tpu.dimension_semantics<parallel>], iteration_bounds = array<i64: 1>, scalar_prefetch = 0 : i64, scratch_operands = 0 : i64, tpu.core_type = #tpu.core_type<tc>, window_params = [{transform_indices = @transform_0, window_bounds = array<i64: 16, 128>}, {transform_indices = @transform_1, window_bounds = array<i64: 2, 8, 128>}, {pipeline_mode = #tpu.pipeline_mode<synchronous>, transform_indices = @transform_2, window_bounds = array<i64: 256, 16>}, {pipeline_mode = #tpu.pipeline_mode<synchronous>, transform_indices = @transform_3, window_bounds = array<i64: 256, 1>}, {pipeline_mode = #tpu.pipeline_mode<synchronous>, transform_indices = @transform_4, window_bounds = array<i64: 256, 256>}, {pipeline_mode = #tpu.pipeline_mode<synchronous>, transform_indices = @transform_5, window_bounds = array<i64: 256, 1>}, {pipeline_mode = #tpu.pipeline_mode<synchronous>, transform_indices = @transform_6, window_bounds = array<i64: 16, 256>}, {pipeline_mode = #tpu.pipeline_mode<synchronous>, transform_indices = @transform_7, window_bounds = array<i64: 16, 1>}, {transform_indices = @transform_8, window_bounds = array<i64: 2, 8, 128>}, {transform_indices = @transform_9, window_bounds = array<i64: 2, 128>}]} {
    %c0 = arith.constant 0 : index
    %c0_0 = arith.constant 0 : index
    %0 = vector.load %arg1[%c0, %c0_0] : memref<16x128xf32, #tpu.memory_space<vmem>>, vector<16x128xf32>
    %c0_1 = arith.constant 0 : index
    %c0_2 = arith.constant 0 : index
    %1 = vector.load %arg3[%c0_1, %c0_2] : memref<256x16xf32, #tpu.memory_space<vmem>>, vector<256x16xf32>
    %cst = arith.constant dense<0.000000e+00> : vector<256x128xf32>
    %2 = tpu.matmul %1, %0, %cst {dimension_numbers = #tpu.dot_dimension_numbers<[1], [0], [0], [1], [0, 0, 1, 1], [], []>} : vector<256x16xf32>, vector<16x128xf32>, vector<256x128xf32> -> vector<256x128xf32>
    %c0_3 = arith.constant 0 : index
    %c0_4 = arith.constant 0 : index
    %3 = vector.load %arg4[%c0_3, %c0_4] : memref<256x1xf32, #tpu.memory_space<vmem>>, vector<256x1xf32>
    %4 = vector.broadcast %3 : vector<256x1xf32> to vector<256x128xf32>
    %5 = arith.addf %2, %4 : vector<256x128xf32>
    %cst_5 = arith.constant 0.000000e+00 : f32
    %6 = vector.broadcast %cst_5 : f32 to vector<256x128xf32>
    %7 = arith.maximumf %5, %6 : vector<256x128xf32>
    %c0_6 = arith.constant 0 : index
    %c0_7 = arith.constant 0 : index
    %8 = vector.load %arg5[%c0_6, %c0_7] : memref<256x256xf32, #tpu.memory_space<vmem>>, vector<256x256xf32>
    %cst_8 = arith.constant dense<0.000000e+00> : vector<256x128xf32>
    %9 = tpu.matmul %8, %7, %cst_8 {dimension_numbers = #tpu.dot_dimension_numbers<[1], [0], [0], [1], [0, 0, 1, 1], [], []>} : vector<256x256xf32>, vector<256x128xf32>, vector<256x128xf32> -> vector<256x128xf32>
    %c0_9 = arith.constant 0 : index
    %c0_10 = arith.constant 0 : index
    %10 = vector.load %arg6[%c0_9, %c0_10] : memref<256x1xf32, #tpu.memory_space<vmem>>, vector<256x1xf32>
    %11 = vector.broadcast %10 : vector<256x1xf32> to vector<256x128xf32>
    %12 = arith.addf %9, %11 : vector<256x128xf32>
    %cst_11 = arith.constant 0.000000e+00 : f32
    %13 = vector.broadcast %cst_11 : f32 to vector<256x128xf32>
    %14 = arith.maximumf %12, %13 : vector<256x128xf32>
    %c0_12 = arith.constant 0 : index
    %c0_13 = arith.constant 0 : index
    %15 = vector.load %arg7[%c0_12, %c0_13] : memref<16x256xf32, #tpu.memory_space<vmem>>, vector<16x256xf32>
    %cst_14 = arith.constant dense<0.000000e+00> : vector<16x128xf32>
    %16 = tpu.matmul %15, %14, %cst_14 {dimension_numbers = #tpu.dot_dimension_numbers<[1], [0], [0], [1], [0, 0, 1, 1], [], []>} : vector<16x256xf32>, vector<256x128xf32>, vector<16x128xf32> -> vector<16x128xf32>
    %c0_15 = arith.constant 0 : index
    %c0_16 = arith.constant 0 : index
    %17 = vector.load %arg8[%c0_15, %c0_16] : memref<16x1xf32, #tpu.memory_space<vmem>>, vector<16x1xf32>
    %18 = vector.broadcast %17 : vector<16x1xf32> to vector<16x128xf32>
    %19 = arith.addf %16, %18 : vector<16x128xf32>
    %20 = vector.extract_strided_slice %19 {offsets = [0, 0], sizes = [8, 128], strides = [1, 1]} : vector<16x128xf32> to vector<8x128xf32>
    %21 = vector.extract_strided_slice %19 {offsets = [8, 0], sizes = [8, 128], strides = [1, 1]} : vector<16x128xf32> to vector<8x128xf32>
    %cst_17 = arith.constant -2.000000e+01 : f32
    %cst_18 = arith.constant 2.000000e+00 : f32
    %22 = vector.broadcast %cst_17 : f32 to vector<8x128xf32>
    %23 = arith.maximumf %22, %21 : vector<8x128xf32>
    %24 = vector.broadcast %cst_18 : f32 to vector<8x128xf32>
    %25 = arith.minimumf %24, %23 : vector<8x128xf32>
    %26 = math.exp %25 : vector<8x128xf32>
    %c0_19 = arith.constant 0 : index
    %c0_20 = arith.constant 0 : index
    %c0_21 = arith.constant 0 : index
    %27 = vector.load %arg2[%c0_19, %c0_20, %c0_21] : memref<2x8x128xf32, #tpu.memory_space<vmem>>, vector<2x8x128xf32>
    %28 = vector.shape_cast %20 : vector<8x128xf32> to vector<1x8x128xf32>
    %29 = vector.shape_cast %26 : vector<8x128xf32> to vector<1x8x128xf32>
    %30 = vector.broadcast %29 : vector<1x8x128xf32> to vector<2x8x128xf32>
    %31 = arith.mulf %30, %27 : vector<2x8x128xf32>
    %32 = vector.broadcast %28 : vector<1x8x128xf32> to vector<2x8x128xf32>
    %33 = arith.addf %32, %31 : vector<2x8x128xf32>
    %cst_22 = arith.constant -5.000000e-01 : f32
    %34 = vector.broadcast %cst_22 : f32 to vector<2x8x128xf32>
    %35 = arith.mulf %34, %27 : vector<2x8x128xf32>
    %36 = arith.mulf %35, %27 : vector<2x8x128xf32>
    %cst_23 = arith.constant 0.693147182 : f32
    %37 = vector.broadcast %cst_23 : f32 to vector<2x8x128xf32>
    %38 = arith.subf %37, %33 : vector<2x8x128xf32>
    %cst_24 = arith.constant -2.000000e+00 : f32
    %39 = vector.broadcast %cst_24 : f32 to vector<2x8x128xf32>
    %40 = arith.mulf %39, %33 : vector<2x8x128xf32>
    %cst_25 = arith.constant 0.000000e+00 : f32
    %41 = vector.broadcast %cst_25 : f32 to vector<2x8x128xf32>
    %42 = arith.maximumf %41, %40 : vector<2x8x128xf32>
    %43 = vector.broadcast %cst_25 : f32 to vector<2x8x128xf32>
    %44 = arith.subf %43, %40 : vector<2x8x128xf32>
    %45 = arith.cmpf one, %44, %44 : vector<2x8x128xf32>
    %46 = vector.broadcast %cst_25 : f32 to vector<2x8x128xf32>
    %47 = arith.addf %46, %40 : vector<2x8x128xf32>
    %48 = math.absf %44 : vector<2x8x128xf32>
    %cst_26 = arith.constant 0.000000e+00 : f32
    %49 = vector.broadcast %cst_26 : f32 to vector<2x8x128xf32>
    %50 = arith.subf %49, %48 : vector<2x8x128xf32>
    %51 = math.exp %50 : vector<2x8x128xf32>
    %52 = math.log1p %51 : vector<2x8x128xf32>
    %53 = arith.addf %42, %52 : vector<2x8x128xf32>
    %54 = arith.select %45, %47, %53 : vector<2x8x128xi1>, vector<2x8x128xf32>
    %55 = arith.subf %38, %54 : vector<2x8x128xf32>
    %cst_27 = arith.constant 2.000000e+00 : f32
    %56 = vector.broadcast %cst_27 : f32 to vector<2x8x128xf32>
    %57 = arith.mulf %56, %55 : vector<2x8x128xf32>
    %58 = arith.subf %36, %57 : vector<2x8x128xf32>
    %cst_28 = arith.constant dense<0.000000e+00> : vector<2x128xf32>
    %59 = vector.multi_reduction <add>, %58, %cst_28 [1] : vector<2x8x128xf32> to vector<2x128xf32>
    %cst_29 = arith.constant dense<0.000000e+00> : vector<128xf32>
    %60 = vector.multi_reduction <add>, %25, %cst_29 [0] : vector<8x128xf32> to vector<128xf32>
    %61 = vector.shape_cast %60 : vector<128xf32> to vector<1x128xf32>
    %62 = vector.broadcast %61 : vector<1x128xf32> to vector<2x128xf32>
    %63 = arith.subf %59, %62 : vector<2x128xf32>
    %cst_30 = arith.constant 7.35150814 : f32
    %64 = vector.broadcast %cst_30 : f32 to vector<2x128xf32>
    %65 = arith.subf %63, %64 : vector<2x128xf32>
    %c0_31 = arith.constant 0 : index
    %c0_32 = arith.constant 0 : index
    %66 = vector.load %arg10[%c0_31, %c0_32] : memref<2x128xf32, #tpu.memory_space<vmem>>, vector<2x128xf32>
    tpu.vector_store %arg10[%c0_31, %c0_32], %65 {strides = array<i32>} : memref<2x128xf32, #tpu.memory_space<vmem>>, vector<2x128xf32>,
    %67 = math.tanh %33 : vector<2x8x128xf32>
    %cst_33 = arith.constant 1.000000e+00 : f32
    %68 = vector.broadcast %cst_33 : f32 to vector<2x8x128xf32>
    %69 = arith.mulf %68, %67 : vector<2x8x128xf32>
    %c0_34 = arith.constant 0 : index
    %c0_35 = arith.constant 0 : index
    %c0_36 = arith.constant 0 : index
    %70 = vector.load %arg9[%c0_34, %c0_35, %c0_36] : memref<2x8x128xf32, #tpu.memory_space<vmem>>, vector<2x8x128xf32>
    tpu.vector_store %arg9[%c0_34, %c0_35, %c0_36], %69 {strides = array<i32>} : memref<2x8x128xf32, #tpu.memory_space<vmem>>, vector<2x8x128xf32>,
    return
  }
  func.func @transform_0(%arg0: i32) -> (i32, i32) {
    %c0_i32 = arith.constant 0 : i32
    %c0_i32_0 = arith.constant 0 : i32
    return %c0_i32, %arg0 : i32, i32
  }
  func.func @transform_1(%arg0: i32) -> (i32, i32, i32) {
    %c0_i32 = arith.constant 0 : i32
    %c0_i32_0 = arith.constant 0 : i32
    %c0_i32_1 = arith.constant 0 : i32
    return %c0_i32, %c0_i32_0, %arg0 : i32, i32, i32
  }
  func.func @transform_2(%arg0: i32) -> (i32, i32) {
    %c0_i32 = arith.constant 0 : i32
    %c0_i32_0 = arith.constant 0 : i32
    %c0_i32_1 = arith.constant 0 : i32
    return %c0_i32, %c0_i32_0 : i32, i32
  }
  func.func @transform_3(%arg0: i32) -> (i32, i32) {
    %c0_i32 = arith.constant 0 : i32
    %c0_i32_0 = arith.constant 0 : i32
    %c0_i32_1 = arith.constant 0 : i32
    return %c0_i32, %c0_i32_0 : i32, i32
  }
  func.func @transform_4(%arg0: i32) -> (i32, i32) {
    %c0_i32 = arith.constant 0 : i32
    %c0_i32_0 = arith.constant 0 : i32
    %c0_i32_1 = arith.constant 0 : i32
    return %c0_i32, %c0_i32_0 : i32, i32
  }
  func.func @transform_5(%arg0: i32) -> (i32, i32) {
    %c0_i32 = arith.constant 0 : i32
    %c0_i32_0 = arith.constant 0 : i32
    %c0_i32_1 = arith.constant 0 : i32
    return %c0_i32, %c0_i32_0 : i32, i32
  }
  func.func @transform_6(%arg0: i32) -> (i32, i32) {
    %c0_i32 = arith.constant 0 : i32
    %c0_i32_0 = arith.constant 0 : i32
    %c0_i32_1 = arith.constant 0 : i32
    return %c0_i32, %c0_i32_0 : i32, i32
  }
  func.func @transform_7(%arg0: i32) -> (i32, i32) {
    %c0_i32 = arith.constant 0 : i32
    %c0_i32_0 = arith.constant 0 : i32
    %c0_i32_1 = arith.constant 0 : i32
    return %c0_i32, %c0_i32_0 : i32, i32
  }
  func.func @transform_8(%arg0: i32) -> (i32, i32, i32) {
    %c0_i32 = arith.constant 0 : i32
    %c0_i32_0 = arith.constant 0 : i32
    %c0_i32_1 = arith.constant 0 : i32
    return %c0_i32, %c0_i32_0, %arg0 : i32, i32, i32
  }
  func.func @transform_9(%arg0: i32) -> (i32, i32) {
    %c0_i32 = arith.constant 0 : i32
    %c0_i32_0 = arith.constant 0 : i32
    return %c0_i32, %arg0 : i32, i32
  }
}

</mosaic_0001>

<bundles_post_ra>
// kernel: tpu_custom_call.1
= control target key start
LH: loop header
LB: loop body
LE: loop exit
PB: predicated region body
PF: predicated region fallthrough
CT: control target
= control target key end

     0   :  { %15 = vsyncpa [#allocation3], 0  ;;  %v1630_v3 = vmov 0   ;;  %vm259_vm0 = vcmask 130048   ;;  %s2514_s0 = inlined_call_operand.vmem [shape: f32[16,128], index: 0, kind: input, shape index: {}]   ;;  %s2515_s1 = inlined_call_operand.vmem [shape: f32[2,8,128], index: 1, kind: input, shape index: {}]   ;;  %s2516_s2 = inlined_call_operand.vmem [shape: f32[256,16], index: 2, kind: input, shape index: {}]   ;;  %s2517_s3 = inlined_call_operand.vmem [shape: f32[256,1], index: 3, kind: input, shape index: {}]   ;;  %s2518_s4 = inlined_call_operand.vmem [shape: f32[256,256], index: 4, kind: input, shape index: {}]   ;;  %s2519_s5 = inlined_call_operand.vmem [shape: f32[256,1], index: 5, kind: input, shape index: {}]   ;;  %s2520_s6 = inlined_call_operand.vmem [shape: f32[16,256], index: 6, kind: input, shape index: {}]   ;;  %s2521_s7 = inlined_call_operand.vmem [shape: f32[16,1], index: 7, kind: input, shape index: {}]   ;;  %s2522_s8 = inlined_call_operand.hbm [shape: f32[2,8,128], index: 8, kind: output, shape index: {0}]   ;;  %s2523_s9 = inlined_call_operand.hbm [shape: f32[2,128], index: 9, kind: output, shape index: {1}]  }
   0x1   :  { %v34_v0 = vld [vmem:[%s2514_s0 + $0x8] sm:$0xff]  ;;  %v82_v1 = vld [vmem:[%s2517_s3 + $0x78] sm:$0xff]  ;;  %1571 = vset.pattern.permute.xlu1 %v1630_v3  ;;  %1570 = vset.pattern.permute.xlu0 %v1630_v3  ;;  %v33_v4 = vld [vmem:[%s2514_s0] sm:$0xff] }
   0x2   :  { %v80_v2 = vld [vmem:[%s2517_s3 + $0x68] sm:$0xff]  ;;  %v35_v5 = vld [vmem:[%s2516_s2] sm:$0xff]  ;;  %1448 = vmatprep.subr.mxu0 %v34_v0  ;;  %176 = vperm.xlu0 %1570, %v82_v1   ;;  %v81_v7 = vld [vmem:[%s2517_s3 + $0x70] sm:$0xff] }
   0x3   :  { %166 = vperm.xlu1 %1571, %v80_v2   ;;  %1449 = vmatpush3.msra.mxu0 %v34_v0  ;;  %v36_v6 = vld [vmem:[%s2516_s2 + $0x8] sm:$0xff]  ;;  %v79_v8 = vld [vmem:[%s2517_s3 + $0x60] sm:$0xff]  ;;  %v37_v9 = vld [vmem:[%s2516_s2 + $0x10] sm:$0xff] }
   0x4   :  { %1450 = vmatprep.subr.mxu0 %v33_v4  ;;  %1452 = vmatprep.mubr.msk.f32.mxu0 %vm259_vm0, %v35_v5  ;;  %v38_v10 = vld [vmem:[%s2516_s2 + $0x18] sm:$0xff]  ;;  %v77_v12 = vld [vmem:[%s2517_s3 + $0x50] sm:$0xff]  ;;  %v39_v13 = vld [vmem:[%s2516_s2 + $0x20] sm:$0xff] }
   0x5   :  { %1451 = vmatpush3.msra.mxu0 %v33_v4  ;;  %v78_v11 = vld [vmem:[%s2517_s3 + $0x58] sm:$0xff]  ;;  %v40_v14 = vld [vmem:[%s2516_s2 + $0x28] sm:$0xff]  ;;  %v75_v16 = vld [vmem:[%s2517_s3 + $0x40] sm:$0xff] }
   0x6   :  { %1453 = vmatmul.mubr.msk.f32.vlgmr.msra.gmra.mxu0 %vm259_vm0, %v36_v6  ;;  %171 = vperm.xlu0 %1570, %v81_v7   ;;  %v76_v15 = vld [vmem:[%s2517_s3 + $0x48] sm:$0xff]  ;;  %v41_v17 = vld [vmem:[%s2516_s2 + $0x30] sm:$0xff]  ;;  %v42_v18 = vld [vmem:[%s2516_s2 + $0x38] sm:$0xff] }
   0x7   :  { %161 = vperm.xlu1 %1571, %v79_v8   ;;  %1455 = vmatprep.mubr.msk.f32.mxu0 %vm259_vm0, %v37_v9  ;;  %v74_v19 = vld [vmem:[%s2517_s3 + $0x38] sm:$0xff]  ;;  %v73_v20 = vld [vmem:[%s2517_s3 + $0x30] sm:$0xff]  ;;  %v43_v21 = vld [vmem:[%s2516_s2 + $0x40] sm:$0xff] }
   0x8   :  { %v44_v22 = vld [vmem:[%s2516_s2 + $0x48] sm:$0xff]  ;;  %v71_v24 = vld [vmem:[%s2517_s3 + $0x20] sm:$0xff]  ;;  %v45_v25 = vld [vmem:[%s2516_s2 + $0x50] sm:$0xff] }
   0x9   :  { %v72_v23 = vld [vmem:[%s2517_s3 + $0x28] sm:$0xff]  ;;  %v46_v26 = vld [vmem:[%s2516_s2 + $0x58] sm:$0xff]  ;;  %v69_v28 = vld [vmem:[%s2517_s3 + $0x10] sm:$0xff] }
   0xa   :  { %1456 = vmatmul.mubr.msk.f32.gmra.mxu0 %vm259_vm0, %v38_v10  ;;  %156 = vperm.xlu0 %1570, %v78_v11   ;;  %v70_v27 = vld [vmem:[%s2517_s3 + $0x18] sm:$0xff]  ;;  %v47_v29 = vld [vmem:[%s2516_s2 + $0x60] sm:$0xff]  ;;  %v48_v30 = vld [vmem:[%s2516_s2 + $0x68] sm:$0xff] }
   0xb   :  { %151 = vperm.xlu1 %1571, %v77_v12   ;;  %1458 = vmatprep.mubr.msk.f32.mxu0 %vm259_vm0, %v39_v13  ;;  %v68_v31 = vld [vmem:[%s2517_s3 + $0x8] sm:$0xff]  ;;  %v67_v32 = vld [vmem:[%s2517_s3] sm:$0xff]  ;;  %v49_v33 = vld [vmem:[%s2516_s2 + $0x70] sm:$0xff] }
   0xc   :  { %v50_v34 = vld [vmem:[%s2516_s2 + $0x78] sm:$0xff]  ;;  %v97_v36 = vld [vmem:[%s2517_s3 + $0xf0] sm:$0xff]  ;;  %v51_v37 = vld [vmem:[%s2516_s2 + $0x80] sm:$0xff] }
   0xd   :  { %v98_v35 = vld [vmem:[%s2517_s3 + $0xf8] sm:$0xff] }
   0xe   :  { %1459 = vmatmul.mubr.msk.f32.gmra.mxu0 %vm259_vm0, %v40_v14  ;;  %146 = vperm.xlu0 %1570, %v76_v15  }
   0xf   :  { %141 = vperm.xlu1 %1571, %v75_v16   ;;  %1461 = vmatprep.mubr.msk.f32.mxu0 %vm259_vm0, %v41_v17 }
  0x12   :  { %1462 = vmatmul.mubr.msk.f32.gmra.mxu0 %vm259_vm0, %v42_v18  ;;  %136 = vperm.xlu0 %1570, %v74_v19  }
  0x13   :  { %131 = vperm.xlu1 %1571, %v73_v20   ;;  %1464 = vmatprep.mubr.msk.f32.mxu0 %vm259_vm0, %v43_v21 }
  0x16   :  { %1465 = vmatmul.mubr.msk.f32.gmra.mxu0 %vm259_vm0, %v44_v22  ;;  %126 = vperm.xlu0 %1570, %v72_v23  }
  0x17   :  { %121 = vperm.xlu1 %1571, %v71_v24   ;;  %1467 = vmatprep.mubr.msk.f32.mxu0 %vm259_vm0, %v45_v25 }
  0x1a   :  { %1468 = vmatmul.mubr.msk.f32.gmra.mxu0 %vm259_vm0, %v46_v26  ;;  %116 = vperm.xlu0 %1570, %v70_v27  }
  0x1b   :  { %111 = vperm.xlu1 %1571, %v69_v28   ;;  %1470 = vmatprep.mubr.msk.f32.mxu0 %vm259_vm0, %v47_v29 }
  0x1e   :  { %1471 = vmatmul.mubr.msk.f32.gmra.mxu0 %vm259_vm0, %v48_v30  ;;  %106 = vperm.xlu0 %1570, %v68_v31  }
  0x1f   :  { %101 = vperm.xlu1 %1571, %v67_v32   ;;  %1473 = vmatprep.mubr.msk.f32.mxu0 %vm259_vm0, %v49_v33 }
  0x20   :  { %16 = vsyncpa [#allocation5], 0  ;;  %v52_v38 = vld [vmem:[%s2516_s2 + $0x88] sm:$0xff]  ;;  %v95_v40 = vld [vmem:[%s2517_s3 + $0xe0] sm:$0xff]  ;;  %v1631_v23 = vmov 0.0  }
  0x21   :  { %v96_v39 = vld [vmem:[%s2517_s3 + $0xe8] sm:$0xff]  ;;  %v53_v41 = vld [vmem:[%s2516_s2 + $0x90] sm:$0xff]  ;;  %v54_v42 = vld [vmem:[%s2516_s2 + $0x98] sm:$0xff]  ;;  %1500 = vmatprep.subr.mxu1 %v1631_v23  ;;  %869 = vmatprep.subr.mxu0 %v1631_v23 }
  0x22   :  { %1474 = vmatmul.mubr.msk.f32.gmra.mxu0 %vm259_vm0, %v50_v34  ;;  %256 = vperm.xlu0 %1570, %v98_v35   ;;  %v94_v43 = vld [vmem:[%s2517_s3 + $0xd8] sm:$0xff]  ;;  %v93_v44 = vld [vmem:[%s2517_s3 + $0xd0] sm:$0xff]  ;;  %v55_v45 = vld [vmem:[%s2516_s2 + $0xa0] sm:$0xff] }
  0x23   :  { %251 = vperm.xlu1 %1571, %v97_v36   ;;  %1476 = vmatprep.mubr.msk.f32.mxu0 %vm259_vm0, %v51_v37  ;;  %v56_v46 = vld [vmem:[%s2516_s2 + $0xa8] sm:$0xff]  ;;  %v91_v48 = vld [vmem:[%s2517_s3 + $0xc0] sm:$0xff]  ;;  %v57_v49 = vld [vmem:[%s2516_s2 + $0xb0] sm:$0xff] }
  0x24   :  { %v92_v47 = vld [vmem:[%s2517_s3 + $0xc8] sm:$0xff]  ;;  %v58_v50 = vld [vmem:[%s2516_s2 + $0xb8] sm:$0xff]  ;;  %v89_v52 = vld [vmem:[%s2517_s3 + $0xb0] sm:$0xff] }
  0x25   :  { %v90_v51 = vld [vmem:[%s2517_s3 + $0xb8] sm:$0xff]  ;;  %v59_v53 = vld [vmem:[%s2516_s2 + $0xc0] sm:$0xff]  ;;  %v60_v54 = vld [vmem:[%s2516_s2 + $0xc8] sm:$0xff] }
  0x26   :  { %1477 = vmatmul.mubr.msk.f32.gmra.mxu0 %vm259_vm0, %v52_v38  ;;  %246 = vperm.xlu0 %1570, %v96_v39   ;;  %v88_v55 = vld [vmem:[%s2517_s3 + $0xa8] sm:$0xff]  ;;  %v87_v56 = vld [vmem:[%s2517_s3 + $0xa0] sm:$0xff]  ;;  %v61_v57 = vld [vmem:[%s2516_s2 + $0xd0] sm:$0xff] }
  0x27   :  { %241 = vperm.xlu1 %1571, %v95_v40   ;;  %1479 = vmatprep.mubr.msk.f32.mxu0 %vm259_vm0, %v53_v41  ;;  %v62_v58 = vld [vmem:[%s2516_s2 + $0xd8] sm:$0xff]  ;;  %v85_v60 = vld [vmem:[%s2517_s3 + $0x90] sm:$0xff]  ;;  %v63_v61 = vld [vmem:[%s2516_s2 + $0xe0] sm:$0xff] }
  0x28   :  { %v86_v59 = vld [vmem:[%s2517_s3 + $0x98] sm:$0xff]  ;;  %v64_v62 = vld [vmem:[%s2516_s2 + $0xe8] sm:$0xff]  ;;  %v83_v0 = vld [vmem:[%s2517_s3 + $0x80] sm:$0xff] }
  0x29   :  { %v84_v63 = vld [vmem:[%s2517_s3 + $0x88] sm:$0xff]  ;;  %v65_v1 = vld [vmem:[%s2516_s2 + $0xf0] sm:$0xff]  ;;  %v66_v2 = vld [vmem:[%s2516_s2 + $0xf8] sm:$0xff] }
  0x2a   :  { %1480 = vmatmul.mubr.msk.f32.gmra.mxu0 %vm259_vm0, %v54_v42  ;;  %236 = vperm.xlu0 %1570, %v94_v43   ;;  %v708_v3 = vld [vmem:[%s2519_s5 + $0xf8] sm:$0xff]  ;;  %v707_v5 = vld [vmem:[%s2519_s5 + $0xf0] sm:$0xff]  ;;  %v706_v7 = vld [vmem:[%s2519_s5 + $0xe8] sm:$0xff] }
  0x2b   :  { %231 = vperm.xlu1 %1571, %v93_v44   ;;  %1482 = vmatprep.mubr.msk.f32.mxu0 %vm259_vm0, %v55_v45  ;;  %v692_v4 = vld [vmem:[%s2519_s5 + $0x78] sm:$0xff]  ;;  %v691_v6 = vld [vmem:[%s2519_s5 + $0x70] sm:$0xff]  ;;  %v690_v8 = vld [vmem:[%s2519_s5 + $0x68] sm:$0xff] }
  0x2c   :  { %v705_v9 = vld [vmem:[%s2519_s5 + $0xe0] sm:$0xff]  ;;  %v704_v11 = vld [vmem:[%s2519_s5 + $0xd8] sm:$0xff]  ;;  %v703_v13 = vld [vmem:[%s2519_s5 + $0xd0] sm:$0xff] }
  0x2d   :  { %v689_v10 = vld [vmem:[%s2519_s5 + $0x60] sm:$0xff]  ;;  %v688_v12 = vld [vmem:[%s2519_s5 + $0x58] sm:$0xff]  ;;  %v687_v14 = vld [vmem:[%s2519_s5 + $0x50] sm:$0xff] }
  0x2e   :  { %1483 = vmatmul.mubr.msk.f32.gmra.mxu0 %vm259_vm0, %v56_v46  ;;  %226 = vperm.xlu0 %1570, %v92_v47   ;;  %v702_v15 = vld [vmem:[%s2519_s5 + $0xc8] sm:$0xff]  ;;  %v701_v17 = vld [vmem:[%s2519_s5 + $0xc0] sm:$0xff]  ;;  %v700_v19 = vld [vmem:[%s2519_s5 + $0xb8] sm:$0xff] }
  0x2f   :  { %221 = vperm.xlu1 %1571, %v91_v48   ;;  %1485 = vmatprep.mubr.msk.f32.mxu0 %vm259_vm0, %v57_v49  ;;  %v686_v16 = vld [vmem:[%s2519_s5 + $0x48] sm:$0xff]  ;;  %v685_v18 = vld [vmem:[%s2519_s5 + $0x40] sm:$0xff]  ;;  %v684_v20 = vld [vmem:[%s2519_s5 + $0x38] sm:$0xff] }
  0x30   :  { %v699_v21 = vld [vmem:[%s2519_s5 + $0xb0] sm:$0xff]  ;;  %v698_v24 = vld [vmem:[%s2519_s5 + $0xa8] sm:$0xff]  ;;  %v697_v26 = vld [vmem:[%s2519_s5 + $0xa0] sm:$0xff] }
  0x31   :  { %v683_v22 = vld [vmem:[%s2519_s5 + $0x30] sm:$0xff]  ;;  %v682_v25 = vld [vmem:[%s2519_s5 + $0x28] sm:$0xff]  ;;  %v681_v27 = vld [vmem:[%s2519_s5 + $0x20] sm:$0xff] }
  0x32   :  { %1486 = vmatmul.mubr.msk.f32.gmra.mxu0 %vm259_vm0, %v58_v50  ;;  %216 = vperm.xlu0 %1570, %v90_v51   ;;  %v696_v28 = vld [vmem:[%s2519_s5 + $0x98] sm:$0xff]  ;;  %v695_v30 = vld [vmem:[%s2519_s5 + $0x90] sm:$0xff]  ;;  %v694_v32 = vld [vmem:[%s2519_s5 + $0x88] sm:$0xff] }
  0x33   :  { %211 = vperm.xlu1 %1571, %v89_v52   ;;  %1488 = vmatprep.mubr.msk.f32.mxu0 %vm259_vm0, %v59_v53  ;;  %v680_v29 = vld [vmem:[%s2519_s5 + $0x18] sm:$0xff]  ;;  %v679_v31 = vld [vmem:[%s2519_s5 + $0x10] sm:$0xff]  ;;  %v678_v33 = vld [vmem:[%s2519_s5 + $0x8] sm:$0xff] }
  0x34   :  { %v693_v34 = vld [vmem:[%s2519_s5 + $0x80] sm:$0xff]  ;;  %v1131_v36 = vld [vmem:[%s2521_s7 + $0x8] sm:$0xff] }
  0x35   :  { %v677_v35 = vld [vmem:[%s2519_s5] sm:$0xff]  ;;  %v614_v38 = vld [vmem:[%s2518_s4 + $0x8] sm:$0xff] }
  0x36   :  { %1489 = vmatmul.mubr.msk.f32.gmra.mxu0 %vm259_vm0, %v60_v54  ;;  %206 = vperm.xlu0 %1570, %v88_v55   ;;  %v1130_v37 = vld [vmem:[%s2521_s7] sm:$0xff]  ;;  %v642_v39 = vld [vmem:[%s2518_s4 + $0xe8] sm:$0xff] }
  0x37   :  { %201 = vperm.xlu1 %1571, %v87_v56   ;;  %1491 = vmatprep.mubr.msk.f32.mxu0 %vm259_vm0, %v61_v57 }
  0x38   :  { %1003 = vmatprep.mubr.f32.mxu1 %v642_v39 }
  0x3a   :  { %1492 = vmatmul.mubr.msk.f32.gmra.mxu0 %vm259_vm0, %v62_v58  ;;  %196 = vperm.xlu0 %1570, %v86_v59  }
  0x3b   :  { %191 = vperm.xlu1 %1571, %v85_v60   ;;  %1494 = vmatprep.mubr.msk.f32.mxu0 %vm259_vm0, %v63_v61 }
  0x3e   :  { %1495 = vmatmul.mubr.msk.f32.gmra.mxu0 %vm259_vm0, %v64_v62  ;;  %186 = vperm.xlu0 %1570, %v84_v63  }
  0x3f   :  { %181 = vperm.xlu1 %1571, %v83_v0   ;;  %1497 = vmatprep.mubr.msk.f32.mxu0 %vm259_vm0, %v65_v1 }
  0x42   :  { %1498 = vmatmul.mubr.msk.f32.gmra.mxu0 %vm259_vm0, %v66_v2  ;;  %866 = vperm.xlu0 %1570, %v708_v3  }
  0x43   :  { %786 = vperm.xlu1 %1571, %v692_v4   ;;  %933 = vmatprep.mubr.f32.mxu0 %v614_v38 }
  0x46   :  { %861 = vperm.xlu0 %1570, %v707_v5  }
  0x47   :  { %781 = vperm.xlu1 %1571, %v691_v6  }
  0x4a   :  { %856 = vperm.xlu0 %1570, %v706_v7  }
  0x4b   :  { %776 = vperm.xlu1 %1571, %v690_v8  }
  0x4e   :  { %851 = vperm.xlu0 %1570, %v705_v9  }
  0x4f   :  { %771 = vperm.xlu1 %1571, %v689_v10  }
  0x52   :  { %846 = vperm.xlu0 %1570, %v704_v11  }
  0x53   :  { %766 = vperm.xlu1 %1571, %v688_v12  }
  0x56   :  { %841 = vperm.xlu0 %1570, %v703_v13  }
  0x57   :  { %761 = vperm.xlu1 %1571, %v687_v14  }
  0x5a   :  { %836 = vperm.xlu0 %1570, %v702_v15  }
  0x5b   :  { %756 = vperm.xlu1 %1571, %v686_v16  }
  0x5e   :  { %831 = vperm.xlu0 %1570, %v701_v17  }
  0x5f   :  { %751 = vperm.xlu1 %1571, %v685_v18  }
  0x62   :  { %826 = vperm.xlu0 %1570, %v700_v19  }
  0x63   :  { %746 = vperm.xlu1 %1571, %v684_v20  }
  0x66   :  { %821 = vperm.xlu0 %1570, %v699_v21  }
  0x67   :  { %741 = vperm.xlu1 %1571, %v683_v22  }
  0x6a   :  { %816 = vperm.xlu0 %1570, %v698_v24  }
  0x6b   :  { %736 = vperm.xlu1 %1571, %v682_v25  }
  0x6e   :  { %811 = vperm.xlu0 %1570, %v697_v26  }
  0x6f   :  { %731 = vperm.xlu1 %1571, %v681_v27  }
  0x72   :  { %806 = vperm.xlu0 %1570, %v696_v28  }
  0x73   :  { %726 = vperm.xlu1 %1571, %v680_v29  }
  0x76   :  { %801 = vperm.xlu0 %1570, %v695_v30  }
  0x77   :  { %721 = vperm.xlu1 %1571, %v679_v31  }
  0x7a   :  { %796 = vperm.xlu0 %1570, %v694_v32  }
  0x7b   :  { %716 = vperm.xlu1 %1571, %v678_v33  }
  0x7d   :  { %v177_v40 = vpop.permute.xlu0 %176 }
  0x7e   :  { %791 = vperm.xlu0 %1570, %v693_v34   ;;  %v167_v41 = vpop.permute.xlu1 %166 }
  0x7f   :  { %711 = vperm.xlu1 %1571, %v677_v35  }
  0x81   :  { %v172_v43 = vpop.permute.xlu0 %171 }
  0x82   :  { %1139 = vperm.xlu0 %1570, %v1131_v36   ;;  %v162_v45 = vpop.permute.xlu1 %161 }
  0x83   :  { %1134 = vperm.xlu1 %1571, %v1130_v37  }
  0x85   :  { %v157_v48 = vpop.permute.xlu0 %156 }
  0x86   :  { %v152_v50 = vpop.permute.xlu1 %151 }
  0x89   :  { %v147_v53 = vpop.permute.xlu0 %146 }
  0x8a   :  { %v142_v55 = vpop.permute.xlu1 %141 }
  0x8d   :  { %v137_v58 = vpop.permute.xlu0 %136 }
  0x8e   :  { %v132_v60 = vpop.permute.xlu1 %131 }
  0x91   :  { %v2040_v63 = vpop.permute.xlu0 %126 }
  0x92   :  { %v2042_v1 = vpop.permute.xlu1 %121 }
  0x95   :  { %v2044_v8 = vpop.permute.xlu0 %116 }
  0x96   :  { %v2048_v12 = vpop.permute.xlu1 %111 }
  0x99   :  { %v2058_v19 = vpop.permute.xlu0 %106 }
  0x9a   :  { %v2064_v24 = vpop.permute.xlu1 %101 }
  0x9d   :  { %v2074_v31 = vpop.permute.xlu0 %256 }
  0x9e   :  { %v2081_v35 = vpop.permute.xlu1 %251 }
  0xc6   :  { %v2026_v42 = vpop.f32.mrf.mxu0 }
  0xc8   :  { %v2028_v44 = vpop.f32.mrf.mxu0 }
  0xca   :  { %v2030_v46 = vpop.f32.mrf.mxu0 }
  0xcc   :  { %v2032_v47 = vpop.f32.mrf.mxu0 }
  0xce   :  { %v2034_v49 = vpop.f32.mrf.mxu0 }
  0xcf   :  { %v448_v37 = vadd.f32 %v2034_v49, %v2040_v63 }
  0xd0   :  { %v2036_v51 = vpop.f32.mrf.mxu0 }
  0xd1   :  { %v586_v49 = vmax.f32 %v448_v37, 0.0 }
  0xd2   :  { %v1463_v52 = vpop.f32.mrf.mxu0 }
  0xd3   :  { %v458_v29 = vadd.f32 %v1463_v52, %v137_v58 }
  0xd4   :  { %v2038_v54 = vpop.f32.mrf.mxu0 }
  0xd5   :  { %v453_v33 = vadd.f32 %v2038_v54, %v132_v60  ;;  %v588_v38 = vmax.f32 %v458_v29, 0.0 }
  0xd6   :  { %v1466_v56 = vpop.f32.mrf.mxu0 }
  0xd7   :  { %v468_v21 = vadd.f32 %v1466_v56, %v147_v53 }
  0xd8   :  { %v462_v57 = vpop.f32.mrf.mxu0 }
  0xd9   :  { %v463_v26 = vadd.f32 %v462_v57, %v142_v55  ;;  %v590_v30 = vmax.f32 %v468_v21, 0.0 }
  0xda   :  { %v1469_v59 = vpop.f32.mrf.mxu0 }
  0xdb   :  { %v478_v14 = vadd.f32 %v1469_v59, %v157_v48  ;;  %v589_v34 = vmax.f32 %v463_v26, 0.0  ;;  %v438_v48 = vadd.f32 %v2030_v46, %v2044_v8  ;;  %v428_v46 = vadd.f32 %v2026_v42, %v2058_v19 }
  0xdc   :  { %v472_v61 = vpop.f32.mrf.mxu0 }
  0xdd   :  { %v473_v17 = vadd.f32 %v472_v61, %v152_v50  ;;  %v592_v22 = vmax.f32 %v478_v14, 0.0  ;;  %v242_v50 = vpop.permute.xlu1 %241  ;;  %v584_v55 = vmax.f32 %v438_v48, 0.0  ;;  %v582_v42 = vmax.f32 %v428_v46, 0.0  ;;  %v616_v48 = vld [vmem:[%s2518_s4 + $0x18] sm:$0xff] }
  0xde   :  { %v1472_v62 = vpop.f32.mrf.mxu0  ;;  %v620_v46 = vld [vmem:[%s2518_s4 + $0x38] sm:$0xff] }
  0xdf   :  { %v488_v5 = vadd.f32 %v1472_v62, %v167_v41  ;;  %v591_v27 = vmax.f32 %v473_v17, 0.0  ;;  %v587_v41 = vmax.f32 %v453_v33, 0.0 }
  0xe0   :  { %v482_v0 = vpop.f32.mrf.mxu0 }
  0xe1   :  { %v483_v10 = vadd.f32 %v482_v0, %v162_v45  ;;  %v594_v15 = vmax.f32 %v488_v5, 0.0  ;;  %v232_v59 = vpop.permute.xlu1 %231 }
  0xe2   :  { %v1475_v2 = vpop.f32.mrf.mxu0 }
  0xe3   :  { %v498_v3 = vadd.f32 %v1475_v2, %v177_v40  ;;  %v593_v18 = vmax.f32 %v483_v10, 0.0  ;;  %v443_v40 = vadd.f32 %v2036_v51, %v2042_v1  ;;  %v433_v51 = vadd.f32 %v2032_v47, %v2048_v12 }
  0xe4   :  { %v492_v4 = vpop.f32.mrf.mxu0  ;;  %v423_v47 = vadd.f32 %v2028_v44, %v2064_v24 }
  0xe5   :  { %v596_v6 = vmax.f32 %v498_v3, 0.0  ;;  %v493_v7 = vadd.f32 %v492_v4, %v172_v43  ;;  %v247_v43 = vpop.permute.xlu0 %246  ;;  %v585_v53 = vmax.f32 %v443_v40, 0.0  ;;  %v583_v58 = vmax.f32 %v433_v51, 0.0  ;;  %v222_v4 = vpop.permute.xlu1 %221  ;;  %v646_v51 = vld [vmem:[%s2518_s4 + $0x108] sm:$0xff] }
  0xe6   :  { %v2046_v9 = vpop.f32.mrf.mxu0  ;;  %v581_v62 = vmax.f32 %v423_v47, 0.0  ;;  %v622_v47 = vld [vmem:[%s2518_s4 + $0x48] sm:$0xff] }
  0xe7   :  { %v595_v11 = vmax.f32 %v493_v7, 0.0  ;;  %870 = vmatpush1.msra.mxu0 %v596_v6  ;;  %1532 = vmatpush1.msra.mxu1 %v596_v6 }
  0xe8   :  { %v2050_v13 = vpop.f32.mrf.mxu0  ;;  %871 = vmatprep.subr.mxu0 %v1631_v23  ;;  %1501 = vmatprep.subr.mxu1 %v1631_v23 }
  0xe9   :  { %872 = vmatpush1.msra.mxu0 %v595_v11  ;;  %1533 = vmatpush1.msra.mxu1 %v595_v11  ;;  %v237_v56 = vpop.permute.xlu0 %236  ;;  %v212_v14 = vpop.permute.xlu1 %211 }
  0xea   :  { %v2054_v16 = vpop.f32.mrf.mxu0  ;;  %873 = vmatprep.subr.mxu0 %v1631_v23  ;;  %1502 = vmatprep.subr.mxu1 %v1631_v23 }
  0xeb   :  { %874 = vmatpush1.msra.mxu0 %v594_v15  ;;  %1534 = vmatpush1.msra.mxu1 %v594_v15 }
  0xec   :  { %v2060_v20 = vpop.f32.mrf.mxu0  ;;  %875 = vmatprep.subr.mxu0 %v1631_v23  ;;  %1503 = vmatprep.subr.mxu1 %v1631_v23 }
  0xed   :  { %876 = vmatpush1.msra.mxu0 %v593_v18  ;;  %1535 = vmatpush1.msra.mxu1 %v593_v18  ;;  %v227_v63 = vpop.permute.xlu0 %226  ;;  %v202_v26 = vpop.permute.xlu1 %201 }
  0xee   :  { %v2066_v25 = vpop.f32.mrf.mxu0  ;;  %877 = vmatprep.subr.mxu0 %v1631_v23  ;;  %1504 = vmatprep.subr.mxu1 %v1631_v23 }
  0xef   :  { %878 = vmatpush1.msra.mxu0 %v592_v22  ;;  %1536 = vmatpush1.msra.mxu1 %v592_v22 }
  0xf0   :  { %v2070_v28 = vpop.f32.mrf.mxu0  ;;  %879 = vmatprep.subr.mxu0 %v1631_v23  ;;  %1505 = vmatprep.subr.mxu1 %v1631_v23 }
  0xf1   :  { %880 = vmatpush1.msra.mxu0 %v591_v27  ;;  %1537 = vmatpush1.msra.mxu1 %v591_v27  ;;  %v217_v10 = vpop.permute.xlu0 %216  ;;  %v523_v33 = vadd.f32 %v2070_v28, %v202_v26  ;;  %v664_v26 = vld [vmem:[%s2518_s4 + $0x198] sm:$0xff] }
  0xf2   :  { %v2076_v32 = vpop.f32.mrf.mxu0  ;;  %881 = vmatprep.subr.mxu0 %v1631_v23  ;;  %1506 = vmatprep.subr.mxu1 %v1631_v23 }
  0xf3   :  { %882 = vmatpush1.msra.mxu0 %v590_v30  ;;  %1538 = vmatpush1.msra.mxu1 %v590_v30  ;;  %v538_v22 = vadd.f32 %v2076_v32, %v217_v10  ;;  %v601_v28 = vmax.f32 %v523_v33, 0.0  ;;  %v629_v10 = vld [vmem:[%s2518_s4 + $0x80] sm:$0xff] }
  0xf4   :  { %v2083_v36 = vpop.f32.mrf.mxu0  ;;  %883 = vmatprep.subr.mxu0 %v1631_v23  ;;  %1507 = vmatprep.subr.mxu1 %v1631_v23  ;;  %v665_v33 = vld [vmem:[%s2518_s4 + $0x1a0] sm:$0xff] }
  0xf5   :  { %884 = vmatpush1.msra.mxu0 %v589_v34  ;;  %1539 = vmatpush1.msra.mxu1 %v589_v34  ;;  %v207_v21 = vpop.permute.xlu0 %206  ;;  %v533_v27 = vadd.f32 %v2083_v36, %v212_v14  ;;  %v660_v14 = vld [vmem:[%s2518_s4 + $0x178] sm:$0xff] }
  0xf6   :  { %v2089_v39 = vpop.f32.mrf.mxu0  ;;  %885 = vmatprep.subr.mxu0 %v1631_v23  ;;  %1508 = vmatprep.subr.mxu1 %v1631_v23  ;;  %v528_v30 = vadd.f32 %v2066_v25, %v207_v21  ;;  %v633_v21 = vld [vmem:[%s2518_s4 + $0xa0] sm:$0xff] }
  0xf7   :  { %886 = vmatpush1.msra.mxu0 %v588_v38  ;;  %1540 = vmatpush1.msra.mxu1 %v588_v38  ;;  %v548_v15 = vadd.f32 %v2089_v39, %v227_v63  ;;  %v603_v34 = vmax.f32 %v533_v27, 0.0  ;;  %v626_v63 = vld [vmem:[%s2518_s4 + $0x68] sm:$0xff]  ;;  %v635_v27 = vld [vmem:[%s2518_s4 + $0xb0] sm:$0xff] }
  0xf8   :  { %v2095_v45 = vpop.f32.mrf.mxu0  ;;  %887 = vmatprep.subr.mxu0 %v1631_v23  ;;  %1509 = vmatprep.subr.mxu1 %v1631_v23  ;;  %v602_v36 = vmax.f32 %v528_v30, 0.0  ;;  %v638_v30 = vld [vmem:[%s2518_s4 + $0xc8] sm:$0xff] }
  0xf9   :  { %888 = vmatpush1.msra.mxu0 %v587_v41  ;;  %1541 = vmatpush1.msra.mxu1 %v587_v41  ;;  %v543_v18 = vadd.f32 %v2095_v45, %v222_v4  ;;  %v606_v24 = vmax.f32 %v548_v15, 0.0  ;;  %v197_v32 = vpop.permute.xlu0 %196  ;;  %v641_v45 = vld [vmem:[%s2518_s4 + $0xe0] sm:$0xff]  ;;  %v656_v4 = vld [vmem:[%s2518_s4 + $0x158] sm:$0xff]  ;;  %v631_v15 = vld [vmem:[%s2518_s4 + $0x90] sm:$0xff] }
  0xfa   :  { %v1493_v52 = vpop.f32.mrf.mxu0  ;;  %889 = vmatprep.subr.mxu0 %v1631_v23  ;;  %1510 = vmatprep.subr.mxu1 %v1631_v23  ;;  %v518_v25 = vadd.f32 %v2054_v16, %v197_v32  ;;  %v637_v32 = vld [vmem:[%s2518_s4 + $0xc0] sm:$0xff] }
  0xfb   :  { %890 = vmatpush1.msra.mxu0 %v586_v49  ;;  %1542 = vmatpush1.msra.mxu1 %v586_v49  ;;  %v558_v7 = vadd.f32 %v1493_v52, %v237_v56  ;;  %v605_v29 = vmax.f32 %v543_v18, 0.0  ;;  %v644_v49 = vld [vmem:[%s2518_s4 + $0xf8] sm:$0xff]  ;;  %v618_v52 = vld [vmem:[%s2518_s4 + $0x28] sm:$0xff]  ;;  %v619_v56 = vld [vmem:[%s2518_s4 + $0x30] sm:$0xff] }
  0xfc   :  { %v552_v54 = vpop.f32.mrf.mxu0  ;;  %891 = vmatprep.subr.mxu0 %v1631_v23  ;;  %1511 = vmatprep.subr.mxu1 %v1631_v23  ;;  %v600_v16 = vmax.f32 %v518_v25, 0.0  ;;  %v634_v18 = vld [vmem:[%s2518_s4 + $0xa8] sm:$0xff]  ;;  %v639_v25 = vld [vmem:[%s2518_s4 + $0xd0] sm:$0xff] }
  0xfd   :  { %892 = vmatpush1.msra.mxu0 %v585_v53  ;;  %1543 = vmatpush1.msra.mxu1 %v585_v53  ;;  %v553_v11 = vadd.f32 %v552_v54, %v232_v59  ;;  %v608_v17 = vmax.f32 %v558_v7, 0.0  ;;  %v187_v38 = vpop.permute.xlu0 %186  ;;  %v617_v53 = vld [vmem:[%s2518_s4 + $0x20] sm:$0xff]  ;;  %v630_v7 = vld [vmem:[%s2518_s4 + $0x88] sm:$0xff] }
  0xfe   :  { %v1496_v57 = vpop.f32.mrf.mxu0  ;;  %893 = vmatprep.subr.mxu0 %v1631_v23  ;;  %1512 = vmatprep.subr.mxu1 %v1631_v23  ;;  %v508_v39 = vadd.f32 %v2046_v9, %v187_v38  ;;  %v645_v54 = vld [vmem:[%s2518_s4 + $0x100] sm:$0xff]  ;;  %v672_v38 = vld [vmem:[%s2518_s4 + $0x1d8] sm:$0xff] }
  0xff   :  { %894 = vmatpush1.msra.mxu0 %v584_v55  ;;  %1544 = vmatpush1.msra.mxu1 %v584_v55  ;;  %v568_v1 = vadd.f32 %v1496_v57, %v247_v43  ;;  %v607_v19 = vmax.f32 %v553_v11, 0.0  ;;  %v648_v55 = vld [vmem:[%s2518_s4 + $0x118] sm:$0xff]  ;;  %v647_v57 = vld [vmem:[%s2518_s4 + $0x110] sm:$0xff]  ;;  %v621_v59 = vld [vmem:[%s2518_s4 + $0x40] sm:$0xff] }
 0x100   :  { %v562_v60 = vpop.f32.mrf.mxu0  ;;  %895 = vmatprep.subr.mxu0 %v1631_v23  ;;  %1513 = vmatprep.subr.mxu1 %v1631_v23  ;;  %v598_v43 = vmax.f32 %v508_v39, 0.0  ;;  %v657_v11 = vld [vmem:[%s2518_s4 + $0x160] sm:$0xff]  ;;  %v671_v39 = vld [vmem:[%s2518_s4 + $0x1d0] sm:$0xff] }
 0x101   :  { %896 = vmatpush1.msra.mxu0 %v583_v58  ;;  %1545 = vmatpush1.msra.mxu1 %v583_v58  ;;  %v563_v5 = vadd.f32 %v562_v60, %v242_v50  ;;  %v610_v8 = vmax.f32 %v568_v1, 0.0  ;;  %v615_v50 = vld [vmem:[%s2518_s4 + $0x10] sm:$0xff]  ;;  %v650_v58 = vld [vmem:[%s2518_s4 + $0x128] sm:$0xff]  ;;  %v649_v60 = vld [vmem:[%s2518_s4 + $0x120] sm:$0xff] }
 0x102   :  { %v1499_v61 = vpop.f32.mrf.mxu0  ;;  %897 = vmatprep.subr.mxu0 %v1631_v23  ;;  %1514 = vmatprep.subr.mxu1 %v1631_v23  ;;  %v625_v1 = vld [vmem:[%s2518_s4 + $0x60] sm:$0xff] }
 0x103   :  { %v578_v44 = vadd.f32 %v1499_v61, %v2074_v31  ;;  %898 = vmatpush1.msra.mxu0 %v582_v42  ;;  %1546 = vmatpush1.msra.mxu1 %v582_v42  ;;  %v609_v12 = vmax.f32 %v563_v5, 0.0  ;;  %v604_v31 = vmax.f32 %v538_v22, 0.0  ;;  %v624_v42 = vld [vmem:[%s2518_s4 + $0x58] sm:$0xff]  ;;  %v627_v5 = vld [vmem:[%s2518_s4 + $0x70] sm:$0xff]  ;;  %v661_v22 = vld [vmem:[%s2518_s4 + $0x180] sm:$0xff] }
 0x104   :  { %v572_v0 = vpop.f32.mrf.mxu0  ;;  %899 = vmatprep.subr.mxu0 %v1631_v23  ;;  %1515 = vmatprep.subr.mxu1 %v1631_v23  ;;  %v652_v61 = vld [vmem:[%s2518_s4 + $0x138] sm:$0xff] }
 0x105   :  { %v612_v2 = vmax.f32 %v578_v44, 0.0  ;;  %v573_v3 = vadd.f32 %v572_v0, %v2081_v35  ;;  %900 = vmatpush1.msra.mxu0 %v581_v62  ;;  %1547 = vmatpush1.msra.mxu1 %v581_v62  ;;  %v192_v35 = vpop.permute.xlu1 %191  ;;  %v623_v62 = vld [vmem:[%s2518_s4 + $0x50] sm:$0xff]  ;;  %v654_v0 = vld [vmem:[%s2518_s4 + $0x148] sm:$0xff] }
 0x106   :  { %901 = vmatprep.subr.mxu0 %v1631_v23  ;;  %1516 = vmatprep.subr.mxu1 %v1631_v23  ;;  %v513_v37 = vadd.f32 %v2060_v20, %v192_v35  ;;  %v651_v44 = vld [vmem:[%s2518_s4 + $0x130] sm:$0xff]  ;;  %v668_v35 = vld [vmem:[%s2518_s4 + $0x1b8] sm:$0xff] }
 0x107   :  { %v611_v6 = vmax.f32 %v573_v3, 0.0  ;;  %902 = vmatpush2.msra.mxu0 %v612_v2  ;;  %1548 = vmatpush2.msra.mxu1 %v612_v2  ;;  %v653_v2 = vld [vmem:[%s2518_s4 + $0x140] sm:$0xff]  ;;  %v628_v3 = vld [vmem:[%s2518_s4 + $0x78] sm:$0xff] }
 0x108   :  { %903 = vmatprep.subr.mxu0 %v1631_v23  ;;  %1517 = vmatprep.subr.mxu1 %v1631_v23  ;;  %v599_v41 = vmax.f32 %v513_v37, 0.0  ;;  %v670_v37 = vld [vmem:[%s2518_s4 + $0x1c8] sm:$0xff] }
 0x109   :  { %904 = vmatpush2.msra.mxu0 %v611_v6  ;;  %1549 = vmatpush2.msra.mxu1 %v611_v6  ;;  %v182_v40 = vpop.permute.xlu1 %181  ;;  %v655_v6 = vld [vmem:[%s2518_s4 + $0x150] sm:$0xff] }
 0x10a   :  { %905 = vmatprep.subr.mxu0 %v1631_v23  ;;  %1518 = vmatprep.subr.mxu1 %v1631_v23  ;;  %v503_v20 = vadd.f32 %v2050_v13, %v182_v40  ;;  %v613_v13 = vld [vmem:[%s2518_s4] sm:$0xff] }
 0x10b   :  { %906 = vmatpush2.msra.mxu0 %v610_v8  ;;  %1550 = vmatpush2.msra.mxu1 %v610_v8  ;;  %v658_v8 = vld [vmem:[%s2518_s4 + $0x168] sm:$0xff]  ;;  %v673_v40 = vld [vmem:[%s2518_s4 + $0x1e0] sm:$0xff] }
 0x10c   :  { %907 = vmatprep.subr.mxu0 %v1631_v23  ;;  %1519 = vmatprep.subr.mxu1 %v1631_v23  ;;  %v597_v9 = vmax.f32 %v503_v20, 0.0  ;;  %v676_v20 = vld [vmem:[%s2518_s4 + $0x1f8] sm:$0xff] }
 0x10d   :  { %908 = vmatpush2.msra.mxu0 %v609_v12  ;;  %1551 = vmatpush2.msra.mxu1 %v609_v12  ;;  %v632_v12 = vld [vmem:[%s2518_s4 + $0x98] sm:$0xff] }
 0x10e   :  { %909 = vmatprep.subr.mxu0 %v1631_v23  ;;  %1520 = vmatprep.subr.mxu1 %v1631_v23 }
 0x10f   :  { %910 = vmatpush2.msra.mxu0 %v608_v17  ;;  %1552 = vmatpush2.msra.mxu1 %v608_v17  ;;  %v659_v17 = vld [vmem:[%s2518_s4 + $0x170] sm:$0xff] }
 0x110   :  { %911 = vmatprep.subr.mxu0 %v1631_v23  ;;  %1521 = vmatprep.subr.mxu1 %v1631_v23 }
 0x111   :  { %912 = vmatpush2.msra.mxu0 %v607_v19  ;;  %1553 = vmatpush2.msra.mxu1 %v607_v19  ;;  %v662_v19 = vld [vmem:[%s2518_s4 + $0x188] sm:$0xff] }
 0x112   :  { %913 = vmatprep.subr.mxu0 %v1631_v23  ;;  %1522 = vmatprep.subr.mxu1 %v1631_v23 }
 0x113   :  { %914 = vmatpush2.msra.mxu0 %v606_v24  ;;  %1554 = vmatpush2.msra.mxu1 %v606_v24  ;;  %v636_v24 = vld [vmem:[%s2518_s4 + $0xb8] sm:$0xff] }
 0x114   :  { %915 = vmatprep.subr.mxu0 %v1631_v23  ;;  %1523 = vmatprep.subr.mxu1 %v1631_v23 }
 0x115   :  { %916 = vmatpush2.msra.mxu0 %v605_v29  ;;  %1555 = vmatpush2.msra.mxu1 %v605_v29  ;;  %v663_v29 = vld [vmem:[%s2518_s4 + $0x190] sm:$0xff] }
 0x116   :  { %917 = vmatprep.subr.mxu0 %v1631_v23  ;;  %1524 = vmatprep.subr.mxu1 %v1631_v23 }
 0x117   :  { %918 = vmatpush2.msra.mxu0 %v604_v31  ;;  %1556 = vmatpush2.msra.mxu1 %v604_v31  ;;  %v666_v31 = vld [vmem:[%s2518_s4 + $0x1a8] sm:$0xff] }
 0x118   :  { %919 = vmatprep.subr.mxu0 %v1631_v23  ;;  %1525 = vmatprep.subr.mxu1 %v1631_v23 }
 0x119   :  { %920 = vmatpush2.msra.mxu0 %v603_v34  ;;  %1557 = vmatpush2.msra.mxu1 %v603_v34  ;;  %v640_v34 = vld [vmem:[%s2518_s4 + $0xd8] sm:$0xff] }
 0x11a   :  { %921 = vmatprep.subr.mxu0 %v1631_v23  ;;  %1526 = vmatprep.subr.mxu1 %v1631_v23 }
 0x11b   :  { %922 = vmatpush2.msra.mxu0 %v602_v36  ;;  %1558 = vmatpush2.msra.mxu1 %v602_v36  ;;  %v667_v36 = vld [vmem:[%s2518_s4 + $0x1b0] sm:$0xff] }
 0x11c   :  { %923 = vmatprep.subr.mxu0 %v1631_v23  ;;  %1527 = vmatprep.subr.mxu1 %v1631_v23 }
 0x11d   :  { %924 = vmatpush2.msra.mxu0 %v601_v28  ;;  %1559 = vmatpush2.msra.mxu1 %v601_v28  ;;  %v669_v28 = vld [vmem:[%s2518_s4 + $0x1c0] sm:$0xff] }
 0x11e   :  { %925 = vmatprep.subr.mxu0 %v1631_v23  ;;  %1528 = vmatprep.subr.mxu1 %v1631_v23 }
 0x11f   :  { %926 = vmatpush2.msra.mxu0 %v600_v16  ;;  %1560 = vmatpush2.msra.mxu1 %v600_v16  ;;  %v674_v16 = vld [vmem:[%s2518_s4 + $0x1e8] sm:$0xff] }
 0x120   :  { %927 = vmatprep.subr.mxu0 %v1631_v23  ;;  %1529 = vmatprep.subr.mxu1 %v1631_v23 }
 0x121   :  { %928 = vmatpush2.msra.mxu0 %v599_v41  ;;  %1561 = vmatpush2.msra.mxu1 %v599_v41  ;;  %v675_v41 = vld [vmem:[%s2518_s4 + $0x1f0] sm:$0xff] }
 0x122   :  { %929 = vmatprep.subr.mxu0 %v1631_v23  ;;  %1530 = vmatprep.subr.mxu1 %v1631_v23 }
 0x123   :  { %930 = vmatpush2.msra.mxu0 %v598_v43  ;;  %1562 = vmatpush2.msra.mxu1 %v598_v43  ;;  %v1127_v43 = vld [vmem:[%s2520_s6 + $0x8] sm:$0xff] }
 0x124   :  { %931 = vmatprep.subr.mxu0 %v1631_v23  ;;  %1531 = vmatprep.subr.mxu1 %v1631_v23  ;;  %v643_v23 = vld [vmem:[%s2518_s4 + $0xf0] sm:$0xff] }
 0x125   :  { %932 = vmatpush2.msra.mxu0 %v597_v9  ;;  %1563 = vmatpush2.msra.mxu1 %v597_v9 }
 0x126   :  { %934 = vmatmul.mubr.f32.vlgmr.msra.gmra.mxu0 %v613_v13  ;;  %1004 = vmatmul.mubr.f32.vlgmr.msra.gmra.mxu1 %v641_v45 }
 0x127   :  { %938 = vmatprep.mubr.f32.mxu0 %v616_v48  ;;  %1008 = vmatprep.mubr.f32.mxu1 %v644_v49 }
 0x12a   :  { %939 = vmatmul.mubr.f32.gmra.mxu0 %v615_v50  ;;  %1009 = vmatmul.mubr.f32.gmra.mxu1 %v643_v23  ;;  %v2360_v23 = vpop.permute.xlu0 %866 }
 0x12b   :  { %943 = vmatprep.mubr.f32.mxu0 %v618_v52  ;;  %1013 = vmatprep.mubr.f32.mxu1 %v646_v51 }
 0x12e   :  { %944 = vmatmul.mubr.f32.gmra.mxu0 %v617_v53  ;;  %1014 = vmatmul.mubr.f32.gmra.mxu1 %v645_v54  ;;  %v2362_v53 = vpop.permute.xlu1 %786 }
 0x12f   :  { %948 = vmatprep.mubr.f32.mxu0 %v620_v46  ;;  %1018 = vmatprep.mubr.f32.mxu1 %v648_v55 }
 0x132   :  { %949 = vmatmul.mubr.f32.gmra.mxu0 %v619_v56  ;;  %1019 = vmatmul.mubr.f32.gmra.mxu1 %v647_v57  ;;  %v2368_v57 = vpop.permute.xlu0 %861 }
 0x133   :  { %953 = vmatprep.mubr.f32.mxu0 %v622_v47  ;;  %1023 = vmatprep.mubr.f32.mxu1 %v650_v58 }
 0x136   :  { %954 = vmatmul.mubr.f32.gmra.mxu0 %v621_v59  ;;  %1024 = vmatmul.mubr.f32.gmra.mxu1 %v649_v60  ;;  %v2374_v59 = vpop.permute.xlu1 %781 }
 0x137   :  { %958 = vmatprep.mubr.f32.mxu0 %v624_v42  ;;  %1028 = vmatprep.mubr.f32.mxu1 %v652_v61 }
 0x13a   :  { %959 = vmatmul.mubr.f32.gmra.mxu0 %v623_v62  ;;  %1029 = vmatmul.mubr.f32.gmra.mxu1 %v651_v44  ;;  %v2380_v44 = vpop.permute.xlu0 %856 }
 0x13b   :  { %963 = vmatprep.mubr.f32.mxu0 %v626_v63  ;;  %1033 = vmatprep.mubr.f32.mxu1 %v654_v0 }
 0x13e   :  { %964 = vmatmul.mubr.f32.gmra.mxu0 %v625_v1  ;;  %1034 = vmatmul.mubr.f32.gmra.mxu1 %v653_v2  ;;  %v2382_v1 = vpop.permute.xlu1 %776 }
 0x13f   :  { %968 = vmatprep.mubr.f32.mxu0 %v628_v3  ;;  %1038 = vmatprep.mubr.f32.mxu1 %v656_v4 }
 0x142   :  { %969 = vmatmul.mubr.f32.gmra.mxu0 %v627_v5  ;;  %1039 = vmatmul.mubr.f32.gmra.mxu1 %v655_v6  ;;  %v2388_v6 = vpop.permute.xlu0 %851 }
 0x143   :  { %973 = vmatprep.mubr.f32.mxu0 %v630_v7  ;;  %1043 = vmatprep.mubr.f32.mxu1 %v658_v8 }
 0x146   :  { %974 = vmatmul.mubr.f32.gmra.mxu0 %v629_v10  ;;  %1044 = vmatmul.mubr.f32.gmra.mxu1 %v657_v11  ;;  %v2394_v10 = vpop.permute.xlu1 %771 }
 0x147   :  { %978 = vmatprep.mubr.f32.mxu0 %v632_v12  ;;  %1048 = vmatprep.mubr.f32.mxu1 %v660_v14 }
 0x14a   :  { %979 = vmatmul.mubr.f32.gmra.mxu0 %v631_v15  ;;  %1049 = vmatmul.mubr.f32.gmra.mxu1 %v659_v17  ;;  %v2400_v17 = vpop.permute.xlu0 %846 }
 0x14b   :  { %983 = vmatprep.mubr.f32.mxu0 %v634_v18  ;;  %1053 = vmatprep.mubr.f32.mxu1 %v662_v19 }
 0x14e   :  { %984 = vmatmul.mubr.f32.gmra.mxu0 %v633_v21  ;;  %1054 = vmatmul.mubr.f32.gmra.mxu1 %v661_v22  ;;  %v2402_v21 = vpop.permute.xlu1 %766 }
 0x14f   :  { %988 = vmatprep.mubr.f32.mxu0 %v636_v24  ;;  %1058 = vmatprep.mubr.f32.mxu1 %v664_v26 }
 0x152   :  { %989 = vmatmul.mubr.f32.gmra.mxu0 %v635_v27  ;;  %1059 = vmatmul.mubr.f32.gmra.mxu1 %v663_v29  ;;  %v842_v29 = vpop.permute.xlu0 %841 }
 0x153   :  { %993 = vmatprep.mubr.f32.mxu0 %v638_v30  ;;  %1063 = vmatprep.mubr.f32.mxu1 %v666_v31 }
 0x156   :  { %994 = vmatmul.mubr.f32.gmra.mxu0 %v637_v32  ;;  %1064 = vmatmul.mubr.f32.gmra.mxu1 %v665_v33  ;;  %v2412_v32 = vpop.permute.xlu1 %761 }
 0x157   :  { %998 = vmatprep.mubr.f32.mxu0 %v640_v34  ;;  %1068 = vmatprep.mubr.f32.mxu1 %v668_v35 }
 0x15a   :  { %999 = vmatmul.mubr.f32.gmra.mxu0 %v639_v25  ;;  %1069 = vmatmul.mubr.f32.gmra.mxu1 %v667_v36  ;;  %v837_v36 = vpop.permute.xlu0 %836 }
 0x15b   :  { %1073 = vmatprep.mubr.f32.mxu1 %v670_v37  ;;  %1206 = vmatprep.mubr.f32.mxu0 %v1127_v43 }
 0x15e   :  { %1074 = vmatmul.mubr.f32.gmra.mxu1 %v669_v28 }
 0x15f   :  { %1078 = vmatprep.mubr.f32.mxu1 %v672_v38  ;;  %v757_v38 = vpop.permute.xlu1 %756 }
 0x162   :  { %1079 = vmatmul.mubr.f32.gmra.mxu1 %v671_v39 }
 0x163   :  { %1083 = vmatprep.mubr.f32.mxu1 %v674_v16 }
 0x166   :  { %1084 = vmatmul.mubr.f32.gmra.mxu1 %v673_v40 }
 0x167   :  { %1088 = vmatprep.mubr.f32.mxu1 %v676_v20 }
 0x16a   :  { %1089 = vmatmul.mubr.f32.gmra.mxu1 %v675_v41  ;;  %v832_v41 = vpop.permute.xlu0 %831 }
 0x1e6   :  { %v2352_v9 = vpop.f32.mrf.mxu0  ;;  %v2354_v13 = vpop.f32.mrf.mxu1 }
 0x1e7   :  { %2524 = vst [vmem:[#allocation8_spill] sm:$0xff] %v2352_v9 }
 0x1e8   :  { %v937_v45 = vpop.f32.mrf.mxu0  ;;  %v1007_v48 = vpop.f32.mrf.mxu1 }
 0x1e9   :  { %v752_v48 = vpop.permute.xlu1 %751 }
 0x1ea   :  { %v2356_v49 = vpop.f32.mrf.mxu0  ;;  %v2358_v50 = vpop.f32.mrf.mxu1 }
 0x1ec   :  { %v942_v52 = vpop.f32.mrf.mxu0  ;;  %v1012_v51 = vpop.f32.mrf.mxu1 }
 0x1ee   :  { %v2364_v54 = vpop.f32.mrf.mxu0  ;;  %v2366_v46 = vpop.f32.mrf.mxu1 }
 0x1ef   :  { %2525 = vst [vmem:[#allocation9_spill] sm:$0xff] %v2366_v46 }
 0x1f0   :  { %v947_v55 = vpop.f32.mrf.mxu0  ;;  %v1017_v56 = vpop.f32.mrf.mxu1 }
 0x1f2   :  { %v2370_v47 = vpop.f32.mrf.mxu0  ;;  %v2372_v58 = vpop.f32.mrf.mxu1 }
 0x1f4   :  { %v952_v60 = vpop.f32.mrf.mxu0  ;;  %v1022_v42 = vpop.f32.mrf.mxu1 }
 0x1f5   :  { %v827_v60 = vpop.permute.xlu0 %826 }
 0x1f6   :  { %v2376_v61 = vpop.f32.mrf.mxu0  ;;  %v2378_v62 = vpop.f32.mrf.mxu1 }
 0x1f8   :  { %v957_v63 = vpop.f32.mrf.mxu0  ;;  %v1027_v0 = vpop.f32.mrf.mxu1 }
 0x1f9   :  { %v747_v0 = vpop.permute.xlu1 %746 }
 0x1fa   :  { %v2384_v2 = vpop.f32.mrf.mxu0  ;;  %v2386_v3 = vpop.f32.mrf.mxu1 }
 0x1fc   :  { %v962_v4 = vpop.f32.mrf.mxu0  ;;  %v1032_v5 = vpop.f32.mrf.mxu1 }
 0x1fe   :  { %v2390_v7 = vpop.f32.mrf.mxu0  ;;  %v2392_v8 = vpop.f32.mrf.mxu1 }
 0x200   :  { %v967_v11 = vpop.f32.mrf.mxu0  ;;  %v1037_v12 = vpop.f32.mrf.mxu1 }
 0x201   :  { %v822_v11 = vpop.permute.xlu0 %821 }
 0x202   :  { %v2396_v14 = vpop.f32.mrf.mxu0  ;;  %v2398_v15 = vpop.f32.mrf.mxu1 }
 0x204   :  { %v972_v18 = vpop.f32.mrf.mxu0  ;;  %v1042_v19 = vpop.f32.mrf.mxu1 }
 0x205   :  { %v742_v18 = vpop.permute.xlu1 %741 }
 0x206   :  { %v2404_v22 = vpop.f32.mrf.mxu0  ;;  %v2406_v24 = vpop.f32.mrf.mxu1 }
 0x208   :  { %v977_v26 = vpop.f32.mrf.mxu0  ;;  %v1047_v27 = vpop.f32.mrf.mxu1 }
 0x209   :  { %v817_v27 = vpop.permute.xlu0 %816 }
 0x20a   :  { %v2408_v30 = vpop.f32.mrf.mxu0  ;;  %v2410_v31 = vpop.f32.mrf.mxu1 }
 0x20c   :  { %v982_v33 = vpop.f32.mrf.mxu0  ;;  %v1052_v34 = vpop.f32.mrf.mxu1 }
 0x20d   :  { %v737_v34 = vpop.permute.xlu1 %736 }
 0x20e   :  { %v985_v35 = vpop.f32.mrf.mxu0  ;;  %v2414_v25 = vpop.f32.mrf.mxu1 }
 0x210   :  { %v987_v37 = vpop.f32.mrf.mxu0  ;;  %v1057_v28 = vpop.f32.mrf.mxu1 }
 0x211   :  { %v1011_v37 = vadd.f32 %v2358_v50, %v2362_v53  ;;  %v732_v9 = vpop.permute.xlu1 %731 }
 0x212   :  { %v990_v39 = vpop.f32.mrf.mxu0  ;;  %v1060_v16 = vpop.f32.mrf.mxu1 }
 0x214   :  { %v992_v40 = vpop.f32.mrf.mxu0  ;;  %v1062_v20 = vpop.f32.mrf.mxu1 }
 0x216   :  { %v995_v43 = vpop.f32.mrf.mxu0  ;;  %v1065_v45 = vpop.f32.mrf.mxu1 }
 0x218   :  { %v997_v52 = vpop.f32.mrf.mxu0  ;;  %v1067_v51 = vpop.f32.mrf.mxu1 }
 0x219   :  { %v1006_v52 = vadd.f32 %v2354_v13, %v2374_v59  ;;  %v991_v59 = vadd.f32 %v990_v39, %v2402_v21  ;;  %v1056_v21 = vadd.f32 %v2414_v25, %v832_v41  ;;  %v966_v25 = vadd.f32 %v2390_v7, %v742_v18 }
 0x21a   :  { %v1000_v55 = vpop.f32.mrf.mxu0  ;;  %v1070_v56 = vpop.f32.mrf.mxu1 }
 0x21b   :  { %v1108_v53 = vmax.f32 %v1006_v52, 0.0 }
 0x21c   :  { %v1072_v42 = vpop.f32.mrf.mxu1  ;;  %v1002_v63 = vpop.f32.mrf.mxu0 }
 0x21e   :  { %v1075_v4 = vpop.f32.mrf.mxu1 }
 0x21f   :  { %v1076_v46 = vadd.f32 %v1075_v4, %v2388_v6  ;;  %v986_v6 = vadd.f32 %v985_v35, %v2412_v32  ;;  %v727_v4 = vpop.permute.xlu1 %726  ;;  %v1051_v32 = vadd.f32 %v2410_v31, %v827_v60  ;;  %v961_v31 = vadd.f32 %v2384_v2, %v737_v34 }
 0x220   :  { %v1077_v5 = vpop.f32.mrf.mxu1 }
 0x221   :  { %v812_v5 = vpop.permute.xlu0 %811 }
 0x222   :  { %v1080_v12 = vpop.f32.mrf.mxu1 }
 0x223   :  { %v1081_v42 = vadd.f32 %v1080_v12, %v2380_v44  ;;  %v1066_v12 = vadd.f32 %v1065_v45, %v842_v29  ;;  %v1104_v29 = vmax.f32 %v986_v6, 0.0 }
 0x224   :  { %v1082_v19 = vpop.f32.mrf.mxu1 }
 0x225   :  { %v1109_v19 = vmax.f32 %v1011_v37, 0.0  ;;  %v1123_v13 = vmax.f32 %v1081_v42, 0.0  ;;  %v1061_v37 = vadd.f32 %v1060_v16, %v837_v36  ;;  %v1120_v39 = vmax.f32 %v1066_v12, 0.0  ;;  %v2526_v42 = vld [vmem:[#allocation9_spill] sm:$0xff] }
 0x226   :  { %v1085_v26 = vpop.f32.mrf.mxu1  ;;  %v971_v36 = vadd.f32 %v2396_v14, %v747_v0  ;;  %v1036_v14 = vadd.f32 %v2392_v8, %v812_v5 }
 0x227   :  { %v1086_v40 = vadd.f32 %v1085_v26, %v2368_v57  ;;  %v996_v57 = vadd.f32 %v995_v43, %v2394_v10  ;;  %v1122_v26 = vmax.f32 %v1076_v46, 0.0  ;;  %v1105_v43 = vmax.f32 %v991_v59, 0.0 }
 0x228   :  { %v1087_v33 = vpop.f32.mrf.mxu1  ;;  %v976_v46 = vadd.f32 %v2404_v22, %v752_v48  ;;  %v1119_v35 = vmax.f32 %v1061_v37, 0.0  ;;  %v1041_v22 = vadd.f32 %v2398_v15, %v817_v27  ;;  %v1117_v48 = vmax.f32 %v1051_v32, 0.0 }
 0x229   :  { %v1001_v33 = vadd.f32 %v1000_v55, %v2382_v1  ;;  %v1124_v50 = vmax.f32 %v1086_v40, 0.0  ;;  %v807_v1 = vpop.permute.xlu0 %806  ;;  %v1106_v55 = vmax.f32 %v996_v57, 0.0  ;;  %v1101_v60 = vmax.f32 %v971_v36, 0.0  ;;  %v1129_v57 = vld [vmem:[%s2520_s6 + $0x18] sm:$0xff] }
 0x22a   :  { %v1090_v28 = vpop.f32.mrf.mxu1  ;;  %v1102_v41 = vmax.f32 %v976_v46, 0.0  ;;  %v1031_v18 = vadd.f32 %v2386_v3, %v807_v1  ;;  %v1115_v40 = vmax.f32 %v1041_v22, 0.0  ;;  %v951_v15 = vadd.f32 %v2370_v47, %v727_v4 }
 0x22b   :  { %v1091_v20 = vadd.f32 %v1090_v28, %v2360_v23  ;;  %v1071_v23 = vadd.f32 %v1070_v56, %v2400_v17  ;;  %v1107_v44 = vmax.f32 %v1001_v33, 0.0  ;;  %v981_v17 = vadd.f32 %v2408_v30, %v757_v38  ;;  %v722_v30 = vpop.permute.xlu1 %721 }
 0x22c   :  { %v1092_v51 = vpop.f32.mrf.mxu1  ;;  %v1046_v38 = vadd.f32 %v2406_v24, %v822_v11  ;;  %v1118_v56 = vmax.f32 %v1056_v21, 0.0  ;;  %v956_v24 = vadd.f32 %v2376_v61, %v732_v9  ;;  %v1100_v11 = vmax.f32 %v966_v25, 0.0 }
 0x22d   :  { %v1125_v63 = vmax.f32 %v1091_v20, 0.0  ;;  %v1121_v10 = vmax.f32 %v1071_v23, 0.0  ;;  %v802_v45 = vpop.permute.xlu0 %801  ;;  %v1103_v16 = vmax.f32 %v981_v17, 0.0  ;;  %v1099_v27 = vmax.f32 %v961_v31, 0.0  ;;  %v1128_v23 = vld [vmem:[%s2520_s6 + $0x10] sm:$0xff]  ;;  %v2463_v17 = vld [vmem:[%s2515_s1] sm:$0xff] }
 0x22e   :  { %v1116_v0 = vmax.f32 %v1046_v38, 0.0  ;;  %v1026_v2 = vadd.f32 %v2378_v62, %v802_v45  ;;  %v1114_v34 = vmax.f32 %v1036_v14, 0.0  ;;  %v946_v8 = vadd.f32 %v2364_v54, %v722_v30  ;;  %v2527_v62 = vld [vmem:[#allocation8_spill] sm:$0xff] }
 0x22f   :  { %1410 = vmatprep.subr.mxu0 %v1125_v63  ;;  %v717_v7 = vpop.permute.xlu1 %716  ;;  %v1098_v20 = vmax.f32 %v956_v24, 0.0  ;;  %v1113_v61 = vmax.f32 %v1031_v18, 0.0  ;;  %v1097_v51 = vmax.f32 %v951_v15, 0.0 }
 0x230   :  { %1411 = vmatpush3.msra.mxu0 %v1109_v19  ;;  %v941_v3 = vadd.f32 %v2356_v49, %v717_v7  ;;  %v1112_v5 = vmax.f32 %v1026_v2, 0.0  ;;  %v1096_v33 = vmax.f32 %v946_v8, 0.0  ;;  %v1126_v49 = vld [vmem:[%s2520_s6] sm:$0xff] }
 0x231   :  { %1412 = vmatprep.subr.mxu0 %v1124_v50  ;;  %v797_v28 = vpop.permute.xlu0 %796 }
 0x232   :  { %1413 = vmatpush3.msra.mxu0 %v1108_v53  ;;  %v1021_v9 = vadd.f32 %v2372_v58, %v797_v28  ;;  %v1095_v50 = vmax.f32 %v941_v3, 0.0 }
 0x233   :  { %1414 = vmatprep.subr.mxu0 %v1123_v13  ;;  %v712_v47 = vpop.permute.xlu1 %711 }
 0x234   :  { %1415 = vmatpush3.msra.mxu0 %v1107_v44  ;;  %v936_v19 = vadd.f32 %v2527_v62, %v712_v47  ;;  %v1111_v54 = vmax.f32 %v1021_v9, 0.0 }
 0x235   :  { %1416 = vmatprep.subr.mxu0 %v1122_v26  ;;  %v792_v52 = vpop.permute.xlu0 %791 }
 0x236   :  { %1417 = vmatpush3.msra.mxu0 %v1106_v55  ;;  %v1016_v63 = vadd.f32 %v2526_v42, %v792_v52  ;;  %v1094_v53 = vmax.f32 %v936_v19, 0.0 }
 0x237   :  { %1418 = vmatprep.subr.mxu0 %v1121_v10 }
 0x238   :  { %1419 = vmatpush3.msra.mxu0 %v1105_v43  ;;  %v1110_v58 = vmax.f32 %v1016_v63, 0.0  ;;  %v2468_v43 = vld [vmem:[%s2515_s1 + $0x8] sm:$0xff]  ;;  %s1632_s1 = smov [#allocation2]  }
 0x239   :  { %1420 = vmatprep.subr.mxu0 %v1120_v39  ;;  %v1140_v1 = vpop.permute.xlu0 %1139  ;;  %v1135_v39 = vpop.permute.xlu1 %1134  ;;  %s1317_s11 = sshll.u32 %s1632_s1, 4  ;;  %s1318_s11 = int_to_ptr.vmem [resolvable:$true] %s1317_s11 }
 0x23a   :  { %1421 = vmatpush3.msra.mxu0 %v1104_v29  ;;  %s1586_s3 = scalar_lea.vmem %s1318_s11, 256  ;;  %p1591_p1 = scmp.lt.s32.totalorder %s1318_s11, %s1318_s11 }
 0x23b   :  { %1422 = vmatprep.subr.mxu0 %v1119_v35  ;;  %p1587_p0 = scmp.ne.s32.totalorder %s1318_s11, %s1586_s3  ;;  %p1592_p2 = scmp.lt.s32.totalorder %s1586_s3, %s1586_s3 }
 0x23c   :  { %1423 = vmatpush3.msra.mxu0 %v1103_v16 }
 0x23d   :  { %1424 = vmatprep.subr.mxu0 %v1118_v56  ;;  %p1593_p3 = por %p1592_p2, %p1591_p1 }
 0x23e   :  { %1425 = vmatpush3.msra.mxu0 %v1102_v41 }
 0x23f   :  { %1426 = vmatprep.subr.mxu0 %v1117_v48  ;;  %p1594_p4 = pnand %p1593_p3, %p1587_p0 }
 0x240   :  { %1427 = vmatpush3.msra.mxu0 %v1101_v60 }
 0x241   :  { %1428 = vmatprep.subr.mxu0 %v1116_v0 }
 0x242   :  { %1429 = vmatpush3.msra.mxu0 %v1100_v11 }
 0x243   :  { %1430 = vmatprep.subr.mxu0 %v1115_v40 }
 0x244   :  { %1431 = vmatpush3.msra.mxu0 %v1099_v27 }
 0x245   :  { %1432 = vmatprep.subr.mxu0 %v1114_v34 }
 0x246   :  { %1433 = vmatpush3.msra.mxu0 %v1098_v20 }
 0x247   :  { %1434 = vmatprep.subr.mxu0 %v1113_v61 }
 0x248   :  { %1435 = vmatpush3.msra.mxu0 %v1097_v51 }
 0x249   :  { %1436 = vmatprep.subr.mxu0 %v1112_v5 }
 0x24a   :  { %1437 = vmatpush3.msra.mxu0 %v1096_v33 }
 0x24b   :  { %1438 = vmatprep.subr.mxu0 %v1111_v54 }
 0x24c   :  { %1439 = vmatpush3.msra.mxu0 %v1095_v50 }
 0x24d   :  { %1440 = vmatprep.subr.mxu0 %v1110_v58 }
 0x24e   :  { %1441 = vmatpush3.msra.mxu0 %v1094_v53 }
 0x24f   :  { %1207 = vmatmul.mubr.f32.vlgmr.msra.gmra.mxu0 %v1126_v49 }
 0x250   :  { %1211 = vmatprep.mubr.f32.mxu0 %v1129_v57 }
 0x253   :  { %1212 = vmatmul.mubr.f32.gmra.mxu0 %v1128_v23 }
 0x30f   :  { %v1442_v13 = vpop.f32.mrf.mxu0 }
 0x311   :  { %v1443_v59 = vpop.f32.mrf.mxu0 }
 0x312   :  { %v1444_v10 = vadd.f32 %v1443_v59, %v1442_v13 }
 0x313   :  { %v1445_v44 = vpop.f32.mrf.mxu0 }
 0x314   :  { %v1209_v46 = vadd.f32 %v1444_v10, %v1135_v39 }
 0x315   :  { %v1446_v12 = vpop.f32.mrf.mxu0 }
 0x316   :  { %v1447_v26 = vadd.f32 %v1446_v12, %v1445_v44 }
 0x318   :  { %v1214_v6 = vadd.f32 %v1447_v26, %v1140_v1 }
 0x31a   :  { %v1217_v55 = vmax.f32 %v1214_v6, -20.0 }
 0x31c   :  { %v2457_v4 = vmin.f32 %v1217_v55, 2.0 }
 0x31e   :  { %v1219_v37 = vmul.f32 1.442695, %v2457_v4 }
 0x320   :  { %1572 = vpow2.f32 %v1219_v37 }
 0x32d   :  { %v1573_v21 = vpop.eup %1572 }
 0x32e   :  { %v1223_v29 = vmul.f32 %v1573_v21, %v2463_v17  ;;  %v1224_v32 = vmul.f32 %v1573_v21, %v2468_v43 }
 0x330   :  { %v2472_v35 = vadd.f32 %v1223_v29, %v1209_v46  ;;  %v2474_v45 = vadd.f32 %v1224_v32, %v1209_v46 }
 0x332   :  { %v2477_v36 = vmul.f32 -2.0, %v2472_v35  ;;  %v2480_v16 = vmul.f32 -2.0, %v2474_v45  ;;  %1574 = vtanh.f32 %v2472_v35 }
 0x333   :  { %1576 = vtanh.f32 %v2474_v45 }
 0x334   :  { %v2484_v30 = vsub.f32 0.0, %v2480_v16  ;;  %v2488_v38 = vsub.f32 0.0, %v2477_v36 }
 0x336   :  { %v1244_v56 = vand.u32 2147483647, %v2484_v30  ;;  %v1243_v25 = vand.u32 2147483647, %v2488_v38 }
 0x338   :  { %v1246_v41 = vsub.f32 0.0, %v1244_v56  ;;  %v1245_v22 = vsub.f32 0.0, %v1243_v25 }
 0x33a   :  { %v1249_v48 = vmul.f32 1.442695, %v1246_v41  ;;  %v1247_v31 = vmul.f32 1.442695, %v1245_v22 }
 0x33c   :  { %1578 = vpow2.f32 %v1249_v48 }
 0x33d   :  { %1580 = vpow2.f32 %v1247_v31 }
 0x33f   :  { %v1575_v60 = vpop.eup %1574 }
 0x340   :  { %v1577_v14 = vpop.eup %1576  ;;  %1310 = vst [vmem:[#allocation2] sm:$0xff] %v1575_v60 }
 0x341   :  { %1311 = vst [vmem:[#allocation2 + $0x8] sm:$0xff] %v1577_v14 }
 0x342   :  { %1597 = shalt.err (!%p1594_p4)
}
 0x343   :  { %s1633_s12 = smov 128   ;;  %s1634_s13 = smov 8   ;;  %v1228_v20 = vmul.f32 -0.5, %v2468_v43  ;;  %v1236_v52 = vmax.f32 %v2480_v16, 0.0  ;;  %v1291_v47 = vrot.slane %v2457_v4, 4  ;;  %v1235_v42 = vmax.f32 %v2477_v36, 0.0 }
 0x344   :  { %1323 = dma.vmem_to_hbm [thread:$0]  %s1318_s11, 256, %s2522_s8, [#allocation3], %s1633_s12, %s1633_s12, %s1634_s13   ;;  %v1227_v5 = vmul.f32 -0.5, %v2463_v17  ;;  %v1232_v33 = vsub.f32 0.6931472, %v2474_v45  ;;  %vm1240_vm3 = vcmp.ne.f32.partialorder %v2484_v30, %v2484_v30  ;;  %vm1239_vm4 = vcmp.ne.f32.partialorder %v2488_v38, %v2488_v38 }
 0x345   :  { %v1231_v50 = vsub.f32 0.6931472, %v2472_v35  ;;  %v1292_v53 = vadd.f32 %v1291_v47, %v2457_v4  ;;  %v1230_v49 = vmul.f32 %v1228_v20, %v2468_v43  ;;  %s1635_s8 = smov [#allocation4]   ;;  %vm1304_vm5 = vcmask 1041409  }
 0x346   :  { %v1229_v13 = vmul.f32 %v1227_v5, %v2463_v17  ;;  %s1330_s2 = sshll.u32 %s1635_s8, 4  ;;  %s1331_s2 = int_to_ptr.vmem [resolvable:$true] %s1330_s2 }
 0x347   :  { %v1293_v26 = vrot.slane %v1292_v53, 2  ;;  %s1606_s16 = scalar_lea.vmem %s1331_s2, 32  ;;  %p1611_p6 = scmp.lt.s32.totalorder %s1331_s2, %s1331_s2 }
 0x348   :  { %p1607_p5 = scmp.ne.s32.totalorder %s1331_s2, %s1606_s16  ;;  %p1612_p7 = scmp.lt.s32.totalorder %s1606_s16, %s1606_s16 }
 0x349   :  { %v1579_v0 = vpop.eup %1578  ;;  %v1294_v10 = vadd.f32 %v1293_v26, %v1292_v53 }
 0x34a   :  { %v1581_v28 = vpop.eup %1580  ;;  %v1260_v24 = vadd.f32 1.0, %v1579_v0  ;;  %v1263_v7 = vmul.f32 -0.5, %v1579_v0  ;;  %v1266_v27 = vand.u32 2147483647, %v1579_v0  ;;  %p1613_p8 = por %p1612_p7, %p1611_p6 }
 0x34b   :  { %v1251_v11 = vadd.f32 1.0, %v1581_v28  ;;  %v1254_v18 = vmul.f32 -0.5, %v1581_v28  ;;  %v1257_v2 = vand.u32 2147483647, %v1581_v28  ;;  %v1295_v43 = vrot.slane %v1294_v10, 1 }
 0x34c   :  { %1582 = vlog2.f32 %v1260_v24  ;;  %v1264_v40 = vadd.f32 1.0, %v1263_v7  ;;  %vm1267_vm1 = vcmp.lt.f32.partialorder %v1266_v27, 0.0004427343  ;;  %p1614_p9 = pnand %p1613_p8, %p1607_p5 }
 0x34d   :  { %1584 = vlog2.f32 %v1251_v11  ;;  %v1255_v15 = vadd.f32 1.0, %v1254_v18  ;;  %vm1258_vm2 = vcmp.lt.f32.partialorder %v1257_v2, 0.0004427343  ;;  %v1296_v17 = vadd.f32 %v1295_v43, %v1294_v10 }
 0x34e   :  { %v1265_v61 = vmul.f32 %v1579_v0, %v1264_v40 }
 0x34f   :  { %v1256_v51 = vmul.f32 %v1581_v28, %v1255_v15 }
 0x359   :  { %v1583_v34 = vpop.eup %1582 }
 0x35a   :  { %v1585_v8 = vpop.eup %1584  ;;  %v1262_v9 = vmul.f32 0.6931472, %v1583_v34 }
 0x35b   :  { %v1253_v3 = vmul.f32 0.6931472, %v1585_v8 }
 0x35c   :  { %v1268_v63 = vsel %vm1267_vm1, %v1265_v61, %v1262_v9 }
 0x35d   :  { %v1259_v62 = vsel %vm1258_vm2, %v1256_v51, %v1253_v3  ;;  %v1270_v19 = vadd.f32 %v1268_v63, %v1236_v52 }
 0x35e   :  { %v1269_v54 = vadd.f32 %v1259_v62, %v1235_v42 }
 0x35f   :  { %v1272_v58 = vsel %vm1240_vm3, %v2480_v16, %v1270_v19 }
 0x360   :  { %v1271_v57 = vsel %vm1239_vm4, %v2477_v36, %v1269_v54  ;;  %v1274_v23 = vsub.f32 %v1232_v33, %v1272_v58 }
 0x361   :  { %v1273_v59 = vsub.f32 %v1231_v50, %v1271_v57 }
 0x362   :  { %v1276_v44 = vmul.f32 2.0, %v1274_v23 }
 0x363   :  { %v1275_v12 = vmul.f32 2.0, %v1273_v59 }
 0x364   :  { %v1278_v1 = vsub.f32 %v1230_v49, %v1276_v44 }
 0x365   :  { %v1277_v6 = vsub.f32 %v1229_v13, %v1275_v12 }
 0x366   :  { %v1285_v55 = vrot.slane %v1278_v1, 4 }
 0x367   :  { %v1279_v37 = vrot.slane %v1277_v6, 4 }
 0x368   :  { %v1286_v21 = vadd.f32 %v1285_v55, %v1278_v1 }
 0x369   :  { %v1280_v39 = vadd.f32 %v1279_v37, %v1277_v6 }
 0x36a   :  { %v1287_v46 = vrot.slane %v1286_v21, 2 }
 0x36b   :  { %v1281_v4 = vrot.slane %v1280_v39, 2 }
 0x36c   :  { %v1288_v29 = vadd.f32 %v1287_v46, %v1286_v21 }
 0x36d   :  { %v1282_v32 = vadd.f32 %v1281_v4, %v1280_v39 }
 0x36e   :  { %v1289_v35 = vrot.slane %v1288_v29, 1 }
 0x36f   :  { %v1283_v45 = vrot.slane %v1282_v32, 1 }
 0x370   :  { %v1290_v36 = vadd.f32 %v1289_v35, %v1288_v29 }
 0x371   :  { %v1284_v16 = vadd.f32 %v1283_v45, %v1282_v32 }
 0x372   :  { %v1298_v30 = vsub.f32 %v1290_v36, %v1296_v17 }
 0x373   :  { %v1297_v38 = vsub.f32 %v1284_v16, %v1296_v17 }
 0x374   :  { %v1375_v56 = vadd.f32 -7.351508, %v1298_v30 }
 0x375   :  { %v1374_v25 = vadd.f32 -7.351508, %v1297_v38 }
 0x376   :  { %v1303_v41 = vrot.slane %v1375_v56, 7 }
 0x378   :  { %v1305_v22 = vsel %vm1304_vm5, %v1303_v41, %v1374_v25 }
 0x379   :  { %1307 = vst [vmem:[#allocation4] sm:$0x3] %v1305_v22 }
 0x37a   :  { %1617 = shalt.err (!%p1614_p9)
}
 0x37b   :  { %1333 = dma.vmem_to_hbm [thread:$0]  %s1331_s2, 32, %s2523_s9, [#allocation5]  }
 0x37c   :  { %1626 = dma.done.wait [#allocation3], 256  }
 0x37d   :  { %1627 = vsyncadd [#allocation3], 4294967040 }
 0x37e   :  { %1628 = dma.done.wait [#allocation5], 32  }
 0x37f   :  { %1629 = vsyncadd [#allocation5], 4294967264 }
 0x380   :  { %1340 = vsyncpa [#allocation3], 1 }
 0x381   :  { %1341 = vsyncpa [#allocation5], 1 }

</bundles_post_ra>
